<compile_context>
chip_gen: v7x
topology: tpu7x:2x2x1
jax: 0.10.0
libtpu: 0.0.40
codegen_flags: <defaults>
</compile_context>

<pallas_src>
import functools

import jax
import jax.numpy as jnp
from jax.experimental import pallas as pl
from jax.experimental.pallas import tpu as pltpu

# ---------------- synthetic model / problem config (small demo shapes) ----------------
B = 2            # batch
LQ = 8           # query length
LR = 16          # response length
H_IN = 32        # embedding dim
H = 64           # hidden dim
V = 256          # vocab size
PAD_ID = 0
TEMPERATURE = 0.7

STATS_W = 128    # lane-dense width of the packed per-row stats output
NEG_BIG = -1e30  # bias value for padded vocab columns (exp() underflows to exactly 0)

ROW_TILE_MAX = 256            # row-tile cap for real shapes (multiple of 16 for bf16)
V_TILE_MAX_BIG_VMEM = 4096    # v5e / v6e (128 MiB physical VMEM)
V_TILE_MAX_SMALL_VMEM = 2048  # v7x (64 MiB VMEM per TensorCore)


def _round_up(a, b):
    return (a + b - 1) // b * b


def _device_tile_defaults():
    """Pick vocab tile size / vmem limit from the chip's VMEM capacity."""
    vmem_cap = 128 * 1024 * 1024
    try:
        vmem_cap = int(getattr(pltpu.get_tpu_info(), "vmem_capacity_bytes", vmem_cap))
    except Exception:
        pass
    if vmem_cap <= 64 * 1024 * 1024:            # v7x-class: 64 MiB per TensorCore
        return V_TILE_MAX_SMALL_VMEM, 40 * 1024 * 1024
    return V_TILE_MAX_BIG_VMEM, 80 * 1024 * 1024


# =====================================================================================
# Kernel: fused  MLP -> LM head -> online log-softmax / entropy / label gather -> value
# Grid: (num_row_tiles, num_vocab_tiles); vocab axis innermost ("arbitrary"),
# row axis "parallel" (shards across TensorCores).
# =====================================================================================
def _ac_head_kernel(lab_rng_ref,                                     # scalar prefetch (SMEM)
                    x_ref, lab_ref, w1_ref, b1_ref, wh_ref, bh_ref, wv_ref,
                    ol_ref, hid_ref, stats_ref,
                    h_scr, m_scr, s_scr, t_scr, g_scr,
                    *, inv_temp, v_tile, stats_w, pad_id):
    i = pl.program_id(0)
    k = pl.program_id(1)

    # ---- init for this row tile (first vocab step): compute hidden once, reset stats
    @pl.when(k == 0)
    def _init():
        x = x_ref[...]                                                  # (TN, H_IN) bf16
        h = jnp.tanh(jnp.dot(x, w1_ref[...],
                             preferred_element_type=jnp.float32)
                     + b1_ref[...])                                     # (TN, H) f32
        hid_ref[...] = h                                                # f32 output block
        h_scr[...] = h.astype(h_scr.dtype)                              # bf16 for the MXU
        m_scr[...] = jnp.full_like(m_scr, -jnp.inf)
        s_scr[...] = jnp.zeros_like(s_scr)
        t_scr[...] = jnp.zeros_like(t_scr)
        g_scr[...] = jnp.zeros_like(g_scr)

    # ---- LM head for the current vocab tile (bf16 MXU, f32 accumulation) ----
    ol = (jnp.dot(h_scr[...], wh_ref[...], preferred_element_type=jnp.float32)
          + bh_ref[...])                                                # (TN, TV) f32
    ol_ref[...] = ol.astype(ol_ref.dtype)                               # bf16 writeback

    # temperature-scaled logits for the softmax path (f32, never materialized to HBM)
    l = ol * inv_temp

    # ---- online log-softmax statistics ----
    tile_max = jnp.max(l, axis=-1, keepdims=True)                       # (TN, 1)
    m_new = jnp.maximum(m_scr[...], tile_max)
    alpha = jnp.exp(m_scr[...] - m_new)
    e = jnp.exp(l - m_new)                                              # (TN, TV)
    s_scr[...] = alpha * s_scr[...] + jnp.sum(e, axis=-1, keepdims=True)
    t_scr[...] = alpha * t_scr[...] + jnp.sum(e * l, axis=-1, keepdims=True)
    m_scr[...] = m_new

    # ---- label logit gather, gated to vocab tiles that can contain a label ----
    tile_lo = k * v_tile
    lab_lo = lab_rng_ref[i, 0]
    lab_hi = lab_rng_ref[i, 1]

    @pl.when(jnp.logical_and(lab_hi >= tile_lo, lab_lo < tile_lo + v_tile))
    def _gather():
        labels = lab_ref[...]                                           # (TN, 1) i32
        col = tile_lo + jax.lax.broadcasted_iota(jnp.int32, l.shape, 1)
        g_scr[...] += jnp.sum(jnp.where(col == labels, l, 0.0),
                              axis=-1, keepdims=True)

    # ---- finalize on the last vocab tile ----
    @pl.when(k == pl.num_programs(1) - 1)
    def _finalize():
        s = s_scr[...]
        lse = m_scr[...] + jnp.log(s)                                   # (TN, 1)
        inv_s = pl.reciprocal(s, approx=True)                           # EUP slot
        ent = lse - t_scr[...] * inv_s                                  # H = lse - E_p[l]
        tok_logp = g_scr[...] - lse
        tok_logp = jnp.where(lab_ref[...] == pad_id, 0.0, tok_logp)     # ignore_index

        # value head on the f32 hidden block resident in VMEM
        vals = jnp.sum(hid_ref[...] * wv_ref[...], axis=-1, keepdims=True)  # (TN, 1)

        # pack the three per-row scalars into one lane-dense (TN, STATS_W) slab:
        # lane 0 = logprob, lane 1 = entropy, lane 2 = value, rest = 0
        lane = jax.lax.broadcasted_iota(jnp.int32, (tok_logp.shape[0], stats_w), 1)
        stats = jnp.where(lane == 0, tok_logp, 0.0)
        stats = jnp.where(lane == 1, ent, stats)
        stats = jnp.where(lane == 2, vals, stats)
        stats_ref[...] = stats


def _call_actor_critic_head(x, labels, w1, b1, w_head, b_head, w_v,
                            *, temperature, row_tile=None, v_tile=None,
                            vmem_limit=None):
    n, h_in = x.shape
    h = w1.shape[1]
    v = w_head.shape[1]

    v_tile_default, vmem_default = _device_tile_defaults()
    if row_tile is None:
        # big row tiles amortize the per-row-tile re-stream of w_head and fill the MXU;
        # multiple of 16 so bf16 x / h_scr tiles are fully-packed sublane vregs.
        row_tile = min(ROW_TILE_MAX, _round_up(max(n, 16), 16))
    if v_tile is None:
        v_tile = min(v_tile_default, _round_up(v, 128))
    if vmem_limit is None:
        vmem_limit = vmem_default

    n_pad = _round_up(n, row_tile)
    v_pad = _round_up(v, v_tile)

    # pad rows (zeros / pad labels) and vocab (zero weights, NEG_BIG bias -> exp()==0)
    x_p = jnp.pad(x, ((0, n_pad - n), (0, 0)))
    lab_p = jnp.pad(labels, ((0, n_pad - n), (0, 0)), constant_values=PAD_ID)
    wh_p = jnp.pad(w_head, ((0, 0), (0, v_pad - v)))
    bh_p = jnp.pad(b_head, ((0, 0), (0, v_pad - v)), constant_values=NEG_BIG)

    grid = (n_pad // row_tile, v_pad // v_tile)

    # per-row-tile [min, max] label range for the scalar-prefetch gather gate
    lab_tiles = lab_p.reshape(grid[0], row_tile)
    lab_range = jnp.stack([lab_tiles.min(axis=1), lab_tiles.max(axis=1)],
                          axis=1).astype(jnp.int32)                      # (n_row_tiles, 2)

    kernel = functools.partial(_ac_head_kernel,
                               inv_temp=1.0 / temperature,
                               v_tile=v_tile, stats_w=STATS_W, pad_id=PAD_ID)

    ol, hid, stats = pl.pallas_call(
        kernel,
        out_shape=(
            jax.ShapeDtypeStruct((n_pad, v_pad), jnp.bfloat16),  # original_logits (bf16)
            jax.ShapeDtypeStruct((n_pad, h), jnp.float32),       # last_hidden_state
            jax.ShapeDtypeStruct((n_pad, STATS_W), jnp.float32), # packed per-row stats
        ),
        grid_spec=pltpu.PrefetchScalarGridSpec(
            num_scalar_prefetch=1,                               # lab_range -> SMEM
            grid=grid,
            in_specs=[
                pl.BlockSpec((row_tile, h_in), lambda i, k, rng: (i, 0)),   # x (bf16)
                pl.BlockSpec((row_tile, 1), lambda i, k, rng: (i, 0)),      # labels (i32)
                pl.BlockSpec((h_in, h), lambda i, k, rng: (0, 0)),          # w1 (bf16)
                pl.BlockSpec((1, h), lambda i, k, rng: (0, 0)),             # b1 (f32)
                pl.BlockSpec((h, v_tile), lambda i, k, rng: (0, k)),        # w_head tile (bf16)
                pl.BlockSpec((1, v_tile), lambda i, k, rng: (0, k)),        # b_head tile (f32)
                pl.BlockSpec((1, h), lambda i, k, rng: (0, 0)),             # value head w (f32)
            ],
            out_specs=(
                pl.BlockSpec((row_tile, v_tile), lambda i, k, rng: (i, k)),   # original_logits
                pl.BlockSpec((row_tile, h), lambda i, k, rng: (i, 0)),        # hidden (resident)
                pl.BlockSpec((row_tile, STATS_W), lambda i, k, rng: (i, 0)),  # stats (k==last)
            ),
            scratch_shapes=[
                pltpu.VMEM((row_tile, h), jnp.bfloat16),   # hidden, bf16 copy for the MXU
                pltpu.VMEM((row_tile, 1), jnp.float32),    # running max m
                pltpu.VMEM((row_tile, 1), jnp.float32),    # running sum exp s
                pltpu.VMEM((row_tile, 1), jnp.float32),    # running sum exp*l t
                pltpu.VMEM((row_tile, 1), jnp.float32),    # accumulated label logit g
            ],
        ),
        compiler_params=pltpu.CompilerParams(
            dimension_semantics=("parallel", "arbitrary"),   # rows across TCs, vocab reduced
            vmem_limit_bytes=vmem_limit,
        ),
    )(lab_range, x_p, lab_p, w1, b1, wh_p, bh_p, w_v)

    return ol[:n, :v], hid[:n], stats[:n]


# =====================================================================================
# Parameters & wrappers
# =====================================================================================
def init_params(key):
    k1, k2, k3, k4, k5 = jax.random.split(key, 5)
    scale_e = 1.0 / jnp.sqrt(H_IN)
    scale_1 = 1.0 / jnp.sqrt(H_IN)
    scale_h = 1.0 / jnp.sqrt(H)
    return dict(
        # base-model weights kept in bf16 (MXU-native), biases in f32
        embedding=(jax.random.normal(k1, (V, H_IN), jnp.float32) * scale_e).astype(jnp.bfloat16),
        w1=(jax.random.normal(k2, (H_IN, H), jnp.float32) * scale_1).astype(jnp.bfloat16),
        b1=jnp.zeros((1, H), jnp.float32),
        w_head=(jax.random.normal(k3, (H, V), jnp.float32) * scale_h).astype(jnp.bfloat16),
        b_head=jax.random.normal(k4, (1, V), jnp.float32) * 0.01,
        # Value head: the spec zero-inits it at construction (checkpoint-loaded later);
        # use small random weights here so the kernel's value path is actually exercised.
        w_v=jax.random.normal(k5, (1, H), jnp.float32) * 0.1,
        b_v=jnp.zeros((1,), jnp.float32),
    )


def actor_critic_forward(params, queries, query_attn_masks, responses,
                         temperature=None, row_tile=None, v_tile=None):
    """ActorCritic.forward: {**policy_out, **value_out}."""
    if temperature is None:
        temperature = TEMPERATURE

    b, lq = queries.shape
    lr = responses.shape[1]
    h_in = params["embedding"].shape[1]
    h = params["w1"].shape[1]
    v = params["w_head"].shape[1]

    input_ids = jnp.concatenate([queries, responses], axis=1)     # (B, T)
    t = lq + lr

    attn = (input_ids != PAD_ID).astype(jnp.int32)
    attn = attn.at[:, :lq].set(query_attn_masks.astype(jnp.int32))

    # Only positions [-LR-1 : -1] feed the heads -> slice BEFORE the embedding gather.
    pos_ids = input_ids[:, t - lr - 1: t - 1]                      # (B, LR)
    pos_mask = attn[:, t - lr - 1: t - 1]                          # (B, LR)
    labels = input_ids[:, t - lr:]                                 # (B, LR)

    emb = jnp.take(params["embedding"], pos_ids, axis=0)           # (B, LR, H_IN) bf16
    x = emb * pos_mask[..., None].astype(jnp.bfloat16)

    n = b * lr
    x_flat = x.reshape(n, h_in)
    labels_flat = labels.reshape(n, 1).astype(jnp.int32)

    ol, hid, stats = _call_actor_critic_head(
        x_flat, labels_flat,
        params["w1"], params["b1"], params["w_head"], params["b_head"], params["w_v"],
        temperature=temperature, row_tile=row_tile, v_tile=v_tile)

    original_logits = ol.reshape(b, lr, v)                 # bf16, straight from the kernel
    # Derived in bf16: the only extra (B,LR,V) materialization is half the old f32 copy;
    # the in-kernel softmax/entropy/logprob path used the exact f32 scaled logits.
    logits = original_logits * (1.0 / temperature)
    logprobs = stats[:, 0].reshape(b, lr)
    entropies = stats[:, 1].reshape(b, lr)
    values = stats[:, 2].reshape(b, lr) + params["b_v"][0]
    last_hidden_state = hid.reshape(b, lr, h)

    return dict(original_logits=original_logits, logits=logits,
                logprobs=logprobs, entropies=entropies,
                last_hidden_state=last_hidden_state, values=values)


def _reference_forward(params, queries, query_attn_masks, responses, temperature=TEMPERATURE):
    """Pure-JAX reference of the same synthetic ActorCritic for the correctness check."""
    b, lq = queries.shape
    lr = responses.shape[1]
    input_ids = jnp.concatenate([queries, responses], axis=1)
    t = lq + lr
    attn = (input_ids != PAD_ID).astype(jnp.int32)
    attn = attn.at[:, :lq].set(query_attn_masks.astype(jnp.int32))

    emb = jnp.take(params["embedding"], input_ids, axis=0)          # bf16
    x = emb * attn[..., None].astype(jnp.bfloat16)
    h = jnp.tanh(jnp.dot(x, params["w1"], preferred_element_type=jnp.float32)
                 + params["b1"])                                    # (B, T, H) f32
    ol_all = (jnp.dot(h.astype(jnp.bfloat16), params["w_head"],
                      preferred_element_type=jnp.float32) + params["b_head"])

    ol = ol_all[:, t - lr - 1: t - 1]
    lg = ol / temperature
    labels = input_ids[:, t - lr:]
    logp = jax.nn.log_softmax(lg, axis=-1)
    p = jax.nn.softmax(lg, axis=-1)
    ent = -jnp.sum(p * logp, axis=-1)
    tok_lp = jnp.take_along_axis(logp, labels[..., None], axis=-1)[..., 0]
    tok_lp = jnp.where(labels == PAD_ID, 0.0, tok_lp)
    hid = h[:, t - lr - 1: t - 1]
    vals = jnp.sum(hid * params["w_v"][0], axis=-1) + params["b_v"][0]
    return dict(original_logits=ol, logits=lg, logprobs=tok_lp, entropies=ent,
                last_hidden_state=hid, values=vals)


if __name__ == "__main__":
    key = jax.random.PRNGKey(0)
    kp, kq, kr = jax.random.split(key, 3)

    params = init_params(kp)
    queries = jax.random.randint(kq, (B, LQ), 1, V, dtype=jnp.int32)
    responses = jax.random.randint(kr, (B, LR), 1, V, dtype=jnp.int32)
    # sprinkle one pad token into responses to exercise the ignore_index path
    responses = responses.at[1, LR - 1].set(PAD_ID)
    query_attn_masks = jnp.ones((B, LQ), dtype=jnp.int32)

    ref = _reference_forward(params, queries, query_attn_masks, responses,
                             temperature=TEMPERATURE)

    # logits are now bf16 outputs -> bf16-level tolerance; entropy uses approx EUP recip.
    tols = {
        "original_logits": (5e-2, 3e-2),
        "logits": (5e-2, 3e-2),
        "logprobs": (2e-3, 2e-3),
        "entropies": (2e-2, 2e-2),
        "last_hidden_state": (2e-3, 2e-3),
        "values": (2e-3, 2e-3),
    }

    # Run 1: explicit small tiles (2 row tiles x 2 vocab tiles) to exercise the full
    # multi-tile grid + online-softmax + gated-gather machinery on the demo shapes.
    out_multi = actor_critic_forward(params, queries, query_attn_masks, responses,
                                     temperature=TEMPERATURE, row_tile=16, v_tile=128)
    jax.block_until_ready(out_multi)

    # Run 2: adaptive production defaults (large tiles; collapses to one block here).
    out_default = actor_critic_forward(params, queries, query_attn_masks, responses,
                                       temperature=TEMPERATURE)
    jax.block_until_ready(out_default)

    for tag, out in (("multi_tile", out_multi), ("default_tile", out_default)):
        for name, (atol, rtol) in tols.items():
            assert out[name].shape == ref[name].shape, (tag, name)
            assert jnp.allclose(out[name], ref[name], atol=atol, rtol=rtol), (tag, name)

    print("KERNEL_OK")
</pallas_src>

<mosaic_0001>
module attributes {stable_mosaic.version = 11 : i64} {
  func.func @_ac_head_kernel(%arg0: i32, %arg1: i32, %arg2: memref<2x2xi32, #tpu.memory_space<smem>>, %arg3: memref<16x32xbf16, #tpu.memory_space<vmem>>, %arg4: memref<16x1xi32, #tpu.memory_space<vmem>>, %arg5: memref<32x64xbf16, #tpu.memory_space<vmem>>, %arg6: memref<1x64xf32, #tpu.memory_space<vmem>>, %arg7: memref<64x128xbf16, #tpu.memory_space<vmem>>, %arg8: memref<1x128xf32, #tpu.memory_space<vmem>>, %arg9: memref<1x64xf32, #tpu.memory_space<vmem>>, %arg10: memref<16x128xbf16, #tpu.memory_space<vmem>>, %arg11: memref<16x64xf32, #tpu.memory_space<vmem>>, %arg12: memref<16x128xf32, #tpu.memory_space<vmem>>, %arg13: memref<16x64xbf16, #tpu.memory_space<vmem>>, %arg14: memref<16x1xf32, #tpu.memory_space<vmem>>, %arg15: memref<16x1xf32, #tpu.memory_space<vmem>>, %arg16: memref<16x1xf32, #tpu.memory_space<vmem>>, %arg17: memref<16x1xf32, #tpu.memory_space<vmem>>) attributes {dimension_semantics = [#tpu.dimension_semantics<parallel>, #tpu.dimension_semantics<arbitrary>], iteration_bounds = array<i64: 2, 2>, scalar_prefetch = 1 : i64, scratch_operands = 5 : i64, tpu.core_type = #tpu.core_type<tc>, window_params = [{transform_indices = @transform_0, window_bounds = array<i64: 16, 32>}, {transform_indices = @transform_1, window_bounds = array<i64: 16, 1>}, {pipeline_mode = #tpu.pipeline_mode<synchronous>, transform_indices = @transform_2, window_bounds = array<i64: 32, 64>}, {pipeline_mode = #tpu.pipeline_mode<synchronous>, transform_indices = @transform_3, window_bounds = array<i64: 1, 64>}, {transform_indices = @transform_4, window_bounds = array<i64: 64, 128>}, {transform_indices = @transform_5, window_bounds = array<i64: 1, 128>}, {pipeline_mode = #tpu.pipeline_mode<synchronous>, transform_indices = @transform_6, window_bounds = array<i64: 1, 64>}, {transform_indices = @transform_7, window_bounds = array<i64: 16, 128>}, {transform_indices = @transform_8, window_bounds = array<i64: 16, 64>}, {transform_indices = @transform_9, window_bounds = array<i64: 16, 128>}]} {
    %c0_i32 = arith.constant 0 : i32
    %0 = arith.cmpi eq, %arg1, %c0_i32 : i32
    %1 = arith.extui %0 : i1 to i32
    %c0_i32_0 = arith.constant 0 : i32
    %2 = arith.cmpi ne, %1, %c0_i32_0 : i32
    scf.if %2 {
      %c0_30 = arith.constant 0 : index
      %c0_31 = arith.constant 0 : index
      %51 = vector.load %arg3[%c0_30, %c0_31] : memref<16x32xbf16, #tpu.memory_space<vmem>>, vector<16x32xbf16>
      %c0_32 = arith.constant 0 : index
      %c0_33 = arith.constant 0 : index
      %52 = vector.load %arg5[%c0_32, %c0_33] : memref<32x64xbf16, #tpu.memory_space<vmem>>, vector<32x64xbf16>
      %cst_34 = arith.constant dense<0.000000e+00> : vector<16x64xf32>
      %53 = tpu.matmul %51, %52, %cst_34 {dimension_numbers = #tpu.dot_dimension_numbers<[1], [0], [0], [1], [0, 0, 1, 1], [], []>} : vector<16x32xbf16>, vector<32x64xbf16>, vector<16x64xf32> -> vector<16x64xf32>
      %c0_35 = arith.constant 0 : index
      %c0_36 = arith.constant 0 : index
      %54 = vector.load %arg6[%c0_35, %c0_36] : memref<1x64xf32, #tpu.memory_space<vmem>>, vector<1x64xf32>
      %55 = vector.broadcast %54 : vector<1x64xf32> to vector<16x64xf32>
      %56 = arith.addf %53, %55 : vector<16x64xf32>
      %57 = math.tanh %56 : vector<16x64xf32>
      %c0_37 = arith.constant 0 : index
      %c0_38 = arith.constant 0 : index
      %58 = vector.load %arg11[%c0_37, %c0_38] : memref<16x64xf32, #tpu.memory_space<vmem>>, vector<16x64xf32>
      tpu.vector_store %arg11[%c0_37, %c0_38], %57 {strides = array<i32>} : memref<16x64xf32, #tpu.memory_space<vmem>>, vector<16x64xf32>,
      %59 = arith.truncf %57 : vector<16x64xf32> to vector<16x64xbf16>
      %c0_39 = arith.constant 0 : index
      %c0_40 = arith.constant 0 : index
      %60 = vector.load %arg13[%c0_39, %c0_40] : memref<16x64xbf16, #tpu.memory_space<vmem>>, vector<16x64xbf16>
      tpu.vector_store %arg13[%c0_39, %c0_40], %59 {strides = array<i32>} : memref<16x64xbf16, #tpu.memory_space<vmem>>, vector<16x64xbf16>,
      %cst_41 = arith.constant 0xFF800000 : f32
      %61 = vector.broadcast %cst_41 : f32 to vector<16x1xf32>
      %c0_42 = arith.constant 0 : index
      %c0_43 = arith.constant 0 : index
      %62 = vector.load %arg14[%c0_42, %c0_43] : memref<16x1xf32, #tpu.memory_space<vmem>>, vector<16x1xf32>
      tpu.vector_store %arg14[%c0_42, %c0_43], %61 {strides = array<i32>} : memref<16x1xf32, #tpu.memory_space<vmem>>, vector<16x1xf32>,
      %cst_44 = arith.constant 0.000000e+00 : f32
      %63 = vector.broadcast %cst_44 : f32 to vector<16x1xf32>
      %c0_45 = arith.constant 0 : index
      %c0_46 = arith.constant 0 : index
      %64 = vector.load %arg15[%c0_45, %c0_46] : memref<16x1xf32, #tpu.memory_space<vmem>>, vector<16x1xf32>
      tpu.vector_store %arg15[%c0_45, %c0_46], %63 {strides = array<i32>} : memref<16x1xf32, #tpu.memory_space<vmem>>, vector<16x1xf32>,
      %cst_47 = arith.constant 0.000000e+00 : f32
      %65 = vector.broadcast %cst_47 : f32 to vector<16x1xf32>
      %c0_48 = arith.constant 0 : index
      %c0_49 = arith.constant 0 : index
      %66 = vector.load %arg16[%c0_48, %c0_49] : memref<16x1xf32, #tpu.memory_space<vmem>>, vector<16x1xf32>
      tpu.vector_store %arg16[%c0_48, %c0_49], %65 {strides = array<i32>} : memref<16x1xf32, #tpu.memory_space<vmem>>, vector<16x1xf32>,
      %cst_50 = arith.constant 0.000000e+00 : f32
      %67 = vector.broadcast %cst_50 : f32 to vector<16x1xf32>
      %c0_51 = arith.constant 0 : index
      %c0_52 = arith.constant 0 : index
      %68 = vector.load %arg17[%c0_51, %c0_52] : memref<16x1xf32, #tpu.memory_space<vmem>>, vector<16x1xf32>
      tpu.vector_store %arg17[%c0_51, %c0_52], %67 {strides = array<i32>} : memref<16x1xf32, #tpu.memory_space<vmem>>, vector<16x1xf32>,
    } else {
    }
    %c0 = arith.constant 0 : index
    %c0_1 = arith.constant 0 : index
    %3 = vector.load %arg13[%c0, %c0_1] : memref<16x64xbf16, #tpu.memory_space<vmem>>, vector<16x64xbf16>
    %c0_2 = arith.constant 0 : index
    %c0_3 = arith.constant 0 : index
    %4 = vector.load %arg7[%c0_2, %c0_3] : memref<64x128xbf16, #tpu.memory_space<vmem>>, vector<64x128xbf16>
    %cst = arith.constant dense<0.000000e+00> : vector<16x128xf32>
    %5 = tpu.matmul %3, %4, %cst {dimension_numbers = #tpu.dot_dimension_numbers<[1], [0], [0], [1], [0, 0, 1, 1], [], []>} : vector<16x64xbf16>, vector<64x128xbf16>, vector<16x128xf32> -> vector<16x128xf32>
    %c0_4 = arith.constant 0 : index
    %c0_5 = arith.constant 0 : index
    %6 = vector.load %arg8[%c0_4, %c0_5] : memref<1x128xf32, #tpu.memory_space<vmem>>, vector<1x128xf32>
    %7 = vector.broadcast %6 : vector<1x128xf32> to vector<16x128xf32>
    %8 = arith.addf %5, %7 : vector<16x128xf32>
    %9 = arith.truncf %8 : vector<16x128xf32> to vector<16x128xbf16>
    %c0_6 = arith.constant 0 : index
    %c0_7 = arith.constant 0 : index
    %10 = vector.load %arg10[%c0_6, %c0_7] : memref<16x128xbf16, #tpu.memory_space<vmem>>, vector<16x128xbf16>
    tpu.vector_store %arg10[%c0_6, %c0_7], %9 {strides = array<i32>} : memref<16x128xbf16, #tpu.memory_space<vmem>>, vector<16x128xbf16>,
    %cst_8 = arith.constant 1.42857146 : f32
    %11 = vector.broadcast %cst_8 : f32 to vector<16x128xf32>
    %12 = arith.mulf %8, %11 : vector<16x128xf32>
    %cst_9 = arith.constant dense<0xFF800000> : vector<16xf32>
    %13 = vector.multi_reduction <maximumf>, %12, %cst_9 [1] : vector<16x128xf32> to vector<16xf32>
    %14 = vector.shape_cast %13 : vector<16xf32> to vector<16x1xf32>
    %c0_10 = arith.constant 0 : index
    %c0_11 = arith.constant 0 : index
    %15 = vector.load %arg14[%c0_10, %c0_11] : memref<16x1xf32, #tpu.memory_space<vmem>>, vector<16x1xf32>
    %16 = arith.maximumf %15, %14 : vector<16x1xf32>
    %c0_12 = arith.constant 0 : index
    %c0_13 = arith.constant 0 : index
    %17 = vector.load %arg14[%c0_12, %c0_13] : memref<16x1xf32, #tpu.memory_space<vmem>>, vector<16x1xf32>
    %18 = arith.subf %17, %16 : vector<16x1xf32>
    %19 = math.exp %18 : vector<16x1xf32>
    %20 = vector.broadcast %16 : vector<16x1xf32> to vector<16x128xf32>
    %21 = arith.subf %12, %20 : vector<16x128xf32>
    %22 = math.exp %21 : vector<16x128xf32>
    %c0_14 = arith.constant 0 : index
    %c0_15 = arith.constant 0 : index
    %23 = vector.load %arg15[%c0_14, %c0_15] : memref<16x1xf32, #tpu.memory_space<vmem>>, vector<16x1xf32>
    %24 = arith.mulf %19, %23 : vector<16x1xf32>
    %cst_16 = arith.constant dense<0.000000e+00> : vector<16xf32>
    %25 = vector.multi_reduction <add>, %22, %cst_16 [1] : vector<16x128xf32> to vector<16xf32>
    %26 = vector.shape_cast %25 : vector<16xf32> to vector<16x1xf32>
    %27 = arith.addf %24, %26 : vector<16x1xf32>
    %c0_17 = arith.constant 0 : index
    %c0_18 = arith.constant 0 : index
    %28 = vector.load %arg15[%c0_17, %c0_18] : memref<16x1xf32, #tpu.memory_space<vmem>>, vector<16x1xf32>
    tpu.vector_store %arg15[%c0_17, %c0_18], %27 {strides = array<i32>} : memref<16x1xf32, #tpu.memory_space<vmem>>, vector<16x1xf32>,
    %c0_19 = arith.constant 0 : index
    %c0_20 = arith.constant 0 : index
    %29 = vector.load %arg16[%c0_19, %c0_20] : memref<16x1xf32, #tpu.memory_space<vmem>>, vector<16x1xf32>
    %30 = arith.mulf %19, %29 : vector<16x1xf32>
    %31 = arith.mulf %22, %12 : vector<16x128xf32>
    %cst_21 = arith.constant dense<0.000000e+00> : vector<16xf32>
    %32 = vector.multi_reduction <add>, %31, %cst_21 [1] : vector<16x128xf32> to vector<16xf32>
    %33 = vector.shape_cast %32 : vector<16xf32> to vector<16x1xf32>
    %34 = arith.addf %30, %33 : vector<16x1xf32>
    %c0_22 = arith.constant 0 : index
    %c0_23 = arith.constant 0 : index
    %35 = vector.load %arg16[%c0_22, %c0_23] : memref<16x1xf32, #tpu.memory_space<vmem>>, vector<16x1xf32>
    tpu.vector_store %arg16[%c0_22, %c0_23], %34 {strides = array<i32>} : memref<16x1xf32, #tpu.memory_space<vmem>>, vector<16x1xf32>,
    %c0_24 = arith.constant 0 : index
    %c0_25 = arith.constant 0 : index
    %36 = vector.load %arg14[%c0_24, %c0_25] : memref<16x1xf32, #tpu.memory_space<vmem>>, vector<16x1xf32>
    tpu.vector_store %arg14[%c0_24, %c0_25], %16 {strides = array<i32>} : memref<16x1xf32, #tpu.memory_space<vmem>>, vector<16x1xf32>,
    %c128_i32 = arith.constant 128 : i32
    %37 = arith.muli %arg1, %c128_i32 : i32
    %38 = arith.index_cast %arg0 : i32 to index
    %c0_26 = arith.constant 0 : index
    %39 = memref.load %arg2[%38, %c0_26] : memref<2x2xi32, #tpu.memory_space<smem>>
    %40 = arith.index_cast %arg0 : i32 to index
    %c1 = arith.constant 1 : index
    %41 = memref.load %arg2[%40, %c1] : memref<2x2xi32, #tpu.memory_space<smem>>
    %42 = arith.cmpi sge, %41, %37 : i32
    %c128_i32_27 = arith.constant 128 : i32
    %43 = arith.addi %37, %c128_i32_27 : i32
    %44 = arith.cmpi slt, %39, %43 : i32
    %45 = arith.andi %42, %44 : i1
    %46 = arith.extui %45 : i1 to i32
    %c0_i32_28 = arith.constant 0 : i32
    %47 = arith.cmpi ne, %46, %c0_i32_28 : i32
    scf.if %47 {
      %c0_30 = arith.constant 0 : index
      %c0_31 = arith.constant 0 : index
      %51 = vector.load %arg4[%c0_30, %c0_31] : memref<16x1xi32, #tpu.memory_space<vmem>>, vector<16x1xi32>
      %52 = tpu.iota {dimensions = array<i32: 1>} : vector<16x128xi32>
      %53 = vector.broadcast %37 : i32 to vector<16x128xi32>
      %54 = arith.addi %53, %52 : vector<16x128xi32>
      %c0_32 = arith.constant 0 : index
      %c0_33 = arith.constant 0 : index
      %55 = vector.load %arg17[%c0_32, %c0_33] : memref<16x1xf32, #tpu.memory_space<vmem>>, vector<16x1xf32>
      %56 = vector.broadcast %51 : vector<16x1xi32> to vector<16x128xi32>
      %57 = arith.cmpi eq, %54, %56 : vector<16x128xi32>
      %cst_34 = arith.constant 0.000000e+00 : f32
      %58 = vector.broadcast %cst_34 : f32 to vector<16x128xf32>
      %59 = arith.select %57, %12, %58 : vector<16x128xi1>, vector<16x128xf32>
      %cst_35 = arith.constant dense<0.000000e+00> : vector<16xf32>
      %60 = vector.multi_reduction <add>, %59, %cst_35 [1] : vector<16x128xf32> to vector<16xf32>
      %61 = vector.shape_cast %60 : vector<16xf32> to vector<16x1xf32>
      %62 = arith.addf %55, %61 : vector<16x1xf32>
      %c0_36 = arith.constant 0 : index
      %c0_37 = arith.constant 0 : index
      %63 = vector.load %arg17[%c0_36, %c0_37] : memref<16x1xf32, #tpu.memory_space<vmem>>, vector<16x1xf32>
      tpu.vector_store %arg17[%c0_36, %c0_37], %62 {strides = array<i32>} : memref<16x1xf32, #tpu.memory_space<vmem>>, vector<16x1xf32>,
    } else {
    }
    %c1_i32 = arith.constant 1 : i32
    %48 = arith.cmpi eq, %arg1, %c1_i32 : i32
    %49 = arith.extui %48 : i1 to i32
    %c0_i32_29 = arith.constant 0 : i32
    %50 = arith.cmpi ne, %49, %c0_i32_29 : i32
    scf.if %50 {
      %c0_30 = arith.constant 0 : index
      %c0_31 = arith.constant 0 : index
      %51 = vector.load %arg15[%c0_30, %c0_31] : memref<16x1xf32, #tpu.memory_space<vmem>>, vector<16x1xf32>
      %c0_32 = arith.constant 0 : index
      %c0_33 = arith.constant 0 : index
      %52 = vector.load %arg14[%c0_32, %c0_33] : memref<16x1xf32, #tpu.memory_space<vmem>>, vector<16x1xf32>
      %53 = math.log %51 : vector<16x1xf32>
      %54 = arith.addf %52, %53 : vector<16x1xf32>
      %55 = tpu.reciprocal %51 {approx = true} : vector<16x1xf32> -> vector<16x1xf32>
      %c0_34 = arith.constant 0 : index
      %c0_35 = arith.constant 0 : index
      %56 = vector.load %arg16[%c0_34, %c0_35] : memref<16x1xf32, #tpu.memory_space<vmem>>, vector<16x1xf32>
      %57 = arith.mulf %56, %55 : vector<16x1xf32>
      %58 = arith.subf %54, %57 : vector<16x1xf32>
      %c0_36 = arith.constant 0 : index
      %c0_37 = arith.constant 0 : index
      %59 = vector.load %arg17[%c0_36, %c0_37] : memref<16x1xf32, #tpu.memory_space<vmem>>, vector<16x1xf32>
      %60 = arith.subf %59, %54 : vector<16x1xf32>
      %c0_38 = arith.constant 0 : index
      %c0_39 = arith.constant 0 : index
      %61 = vector.load %arg4[%c0_38, %c0_39] : memref<16x1xi32, #tpu.memory_space<vmem>>, vector<16x1xi32>
      %c0_i32_40 = arith.constant 0 : i32
      %62 = vector.broadcast %c0_i32_40 : i32 to vector<16x1xi32>
      %63 = arith.cmpi eq, %61, %62 : vector<16x1xi32>
      %cst_41 = arith.constant 0.000000e+00 : f32
      %64 = vector.broadcast %cst_41 : f32 to vector<16x1xf32>
      %65 = arith.select %63, %64, %60 : vector<16x1xi1>, vector<16x1xf32>
      %c0_42 = arith.constant 0 : index
      %c0_43 = arith.constant 0 : index
      %66 = vector.load %arg11[%c0_42, %c0_43] : memref<16x64xf32, #tpu.memory_space<vmem>>, vector<16x64xf32>
      %c0_44 = arith.constant 0 : index
      %c0_45 = arith.constant 0 : index
      %67 = vector.load %arg9[%c0_44, %c0_45] : memref<1x64xf32, #tpu.memory_space<vmem>>, vector<1x64xf32>
      %68 = vector.broadcast %67 : vector<1x64xf32> to vector<16x64xf32>
      %69 = arith.mulf %66, %68 : vector<16x64xf32>
      %cst_46 = arith.constant dense<0.000000e+00> : vector<16xf32>
      %70 = vector.multi_reduction <add>, %69, %cst_46 [1] : vector<16x64xf32> to vector<16xf32>
      %71 = vector.shape_cast %70 : vector<16xf32> to vector<16x1xf32>
      %72 = tpu.iota {dimensions = array<i32: 1>} : vector<16x128xi32>
      %c0_i32_47 = arith.constant 0 : i32
      %73 = vector.broadcast %c0_i32_47 : i32 to vector<16x128xi32>
      %74 = arith.cmpi eq, %72, %73 : vector<16x128xi32>
      %cst_48 = arith.constant 0.000000e+00 : f32
      %75 = vector.shape_cast %65 : vector<16x1xf32> to vector<16x1xf32>
      %76 = vector.broadcast %75 : vector<16x1xf32> to vector<16x128xf32>
      %77 = vector.broadcast %cst_48 : f32 to vector<16x128xf32>
      %78 = arith.select %74, %76, %77 : vector<16x128xi1>, vector<16x128xf32>
      %c1_i32_49 = arith.constant 1 : i32
      %79 = vector.broadcast %c1_i32_49 : i32 to vector<16x128xi32>
      %80 = arith.cmpi eq, %72, %79 : vector<16x128xi32>
      %81 = vector.shape_cast %58 : vector<16x1xf32> to vector<16x1xf32>
      %82 = vector.broadcast %81 : vector<16x1xf32> to vector<16x128xf32>
      %83 = arith.select %80, %82, %78 : vector<16x128xi1>, vector<16x128xf32>
      %c2_i32 = arith.constant 2 : i32
      %84 = vector.broadcast %c2_i32 : i32 to vector<16x128xi32>
      %85 = arith.cmpi eq, %72, %84 : vector<16x128xi32>
      %86 = vector.shape_cast %71 : vector<16x1xf32> to vector<16x1xf32>
      %87 = vector.broadcast %86 : vector<16x1xf32> to vector<16x128xf32>
      %88 = arith.select %85, %87, %83 : vector<16x128xi1>, vector<16x128xf32>
      %c0_50 = arith.constant 0 : index
      %c0_51 = arith.constant 0 : index
      %89 = vector.load %arg12[%c0_50, %c0_51] : memref<16x128xf32, #tpu.memory_space<vmem>>, vector<16x128xf32>
      tpu.vector_store %arg12[%c0_50, %c0_51], %88 {strides = array<i32>} : memref<16x128xf32, #tpu.memory_space<vmem>>, vector<16x128xf32>,
    } else {
    }
    return
  }
  func.func @transform_0(%arg0: i32, %arg1: i32, %arg2: memref<2x2xi32, #tpu.memory_space<smem>>) -> (i32, i32) {
    %c0_i32 = arith.constant 0 : i32
    %c0_i32_0 = arith.constant 0 : i32
    return %arg0, %c0_i32 : i32, i32
  }
  func.func @transform_1(%arg0: i32, %arg1: i32, %arg2: memref<2x2xi32, #tpu.memory_space<smem>>) -> (i32, i32) {
    %c0_i32 = arith.constant 0 : i32
    %c0_i32_0 = arith.constant 0 : i32
    return %arg0, %c0_i32 : i32, i32
  }
  func.func @transform_2(%arg0: i32, %arg1: i32, %arg2: memref<2x2xi32, #tpu.memory_space<smem>>) -> (i32, i32) {
    %c0_i32 = arith.constant 0 : i32
    %c0_i32_0 = arith.constant 0 : i32
    %c0_i32_1 = arith.constant 0 : i32
    return %c0_i32, %c0_i32_0 : i32, i32
  }
  func.func @transform_3(%arg0: i32, %arg1: i32, %arg2: memref<2x2xi32, #tpu.memory_space<smem>>) -> (i32, i32) {
    %c0_i32 = arith.constant 0 : i32
    %c0_i32_0 = arith.constant 0 : i32
    %c0_i32_1 = arith.constant 0 : i32
    return %c0_i32, %c0_i32_0 : i32, i32
  }
  func.func @transform_4(%arg0: i32, %arg1: i32, %arg2: memref<2x2xi32, #tpu.memory_space<smem>>) -> (i32, i32) {
    %c0_i32 = arith.constant 0 : i32
    %c0_i32_0 = arith.constant 0 : i32
    return %c0_i32, %arg1 : i32, i32
  }
  func.func @transform_5(%arg0: i32, %arg1: i32, %arg2: memref<2x2xi32, #tpu.memory_space<smem>>) -> (i32, i32) {
    %c0_i32 = arith.constant 0 : i32
    %c0_i32_0 = arith.constant 0 : i32
    return %c0_i32, %arg1 : i32, i32
  }
  func.func @transform_6(%arg0: i32, %arg1: i32, %arg2: memref<2x2xi32, #tpu.memory_space<smem>>) -> (i32, i32) {
    %c0_i32 = arith.constant 0 : i32
    %c0_i32_0 = arith.constant 0 : i32
    %c0_i32_1 = arith.constant 0 : i32
    return %c0_i32, %c0_i32_0 : i32, i32
  }
  func.func @transform_7(%arg0: i32, %arg1: i32, %arg2: memref<2x2xi32, #tpu.memory_space<smem>>) -> (i32, i32) {
    %c0_i32 = arith.constant 0 : i32
    return %arg0, %arg1 : i32, i32
  }
  func.func @transform_8(%arg0: i32, %arg1: i32, %arg2: memref<2x2xi32, #tpu.memory_space<smem>>) -> (i32, i32) {
    %c0_i32 = arith.constant 0 : i32
    %c0_i32_0 = arith.constant 0 : i32
    return %arg0, %c0_i32 : i32, i32
  }
  func.func @transform_9(%arg0: i32, %arg1: i32, %arg2: memref<2x2xi32, #tpu.memory_space<smem>>) -> (i32, i32) {
    %c0_i32 = arith.constant 0 : i32
    %c0_i32_0 = arith.constant 0 : i32
    return %arg0, %c0_i32 : i32, i32
  }
}

</mosaic_0001>

<bundles_post_ra>
// kernel: tpu_custom_call.1
= control target key start
LH: loop header
LB: loop body
LE: loop exit
PB: predicated region body
PF: predicated region fallthrough
CT: control target
= control target key end

     0   :  { %s2765_s0 = inlined_call_operand.hbm [shape: s32[2,2], index: 0, kind: input, shape index: {}]   ;;  %s2766_s1 = inlined_call_operand.hbm [shape: bf16[32,32], index: 1, kind: input, shape index: {}]   ;;  %s2767_s2 = inlined_call_operand.hbm [shape: s32[32,1], index: 2, kind: input, shape index: {}]   ;;  %s2768_s3 = inlined_call_operand.hbm [shape: bf16[32,64], index: 3, kind: input, shape index: {}]   ;;  %s2769_s4 = inlined_call_operand.hbm [shape: f32[1,64], index: 4, kind: input, shape index: {}]   ;;  %s2770_s5 = inlined_call_operand.hbm [shape: bf16[64,256], index: 5, kind: input, shape index: {}]   ;;  %s2771_s6 = inlined_call_operand.hbm [shape: f32[1,256], index: 6, kind: input, shape index: {}]   ;;  %s2772_s7 = inlined_call_operand.hbm [shape: f32[1,64], index: 7, kind: input, shape index: {}]   ;;  %s2773_s8 = inlined_call_operand.hbm [shape: bf16[32,256], index: 8, kind: output, shape index: {0}]   ;;  %s2774_s9 = inlined_call_operand.hbm [shape: f32[32,64], index: 9, kind: output, shape index: {1}]   ;;  %s2775_s10 = inlined_call_operand.hbm [shape: f32[32,128], index: 10, kind: output, shape index: {2}]  }
   0x1   :  { %2817 = sst [smem:[#allocation53_spill]] %s2766_s1  ;;  %s1531_s15 = scalar_lea.hbm %s2765_s0, 32 }
   0x2   :  { %2818 = sst [smem:[#allocation54_spill]] %s2767_s2  ;;  %p1532_p0 = scmp.ne.s32.totalorder %s2765_s0, %s1531_s15 }
   0x3   :  { %2819 = sst [smem:[#allocation55_spill]] %s2768_s3  ;;  %p1535_p1 = scmp.lt.u32.totalorder %s1531_s15, %s2765_s0 }
   0x4   :  { %2820 = sst [smem:[#allocation56_spill]] %s2769_s4 }
   0x5   :  { %2821 = sst [smem:[#allocation57_spill]] %s2770_s5  ;;  %p1537_p2 = pnand %p1535_p1, %p1532_p0 }
   0x6   :  { %2822 = sst [smem:[#allocation58_spill]] %s2771_s6 }
   0x7   :  { %2823 = sst [smem:[#allocation59_spill]] %s2772_s7 }
   0x8   :  { %2824 = sst [smem:[#allocation60_spill]] %s2773_s8 }
   0x9   :  { %2825 = sst [smem:[#allocation61_spill]] %s2774_s9 }
   0xa   :  { %2826 = sst [smem:[#allocation62_spill]] %s2775_s10 }
   0xb   :  { %1540 = shalt.err (!%p1537_p2)  }
   0xc   :  { %s1979_s20 = smov [#allocation8]  }
   0xd   :  { %17 = dma.hbm_to_smem %s2765_s0, 32, %s1979_s20, [#allocation7] }
   0xe   :  { %1885 = dma.done.wait [#allocation7], 32 }
   0xf   :  { %1886 = vsyncadd [#allocation7], 4294967264 }
  0x10   :  { %19 = sfence }
  0x11   :  { %20 = vsyncpa [#allocation10], 0 }
  0x12   :  { %22 = vsyncpa [#allocation10 + $0x1], 0 }
  0x13   :  { %23 = vsyncpa [#allocation13], 0 }
  0x14   :  { %25 = vsyncpa [#allocation13 + $0x1], 0 }
  0x15   :  { %26 = vsyncpa [#allocation16], 0 }
  0x16   :  { %27 = vsyncpa [#allocation11], 0 }
  0x17   :  { %29 = vsyncpa [#allocation11 + $0x1], 0 }
  0x18   :  { %30 = vsyncpa [#allocation22], 0 }
  0x19   :  { %32 = vsyncpa [#allocation22 + $0x1], 0  ;;  %s2073_s23 = smov 0   ;;  %s2075_s24 = smov 0  }
  0x1a   :  { %s2077_s25 = smov 0   ;;  %s2079_s26 = smov 0  }
  0x1b   :  { %s2081_s0 = smov 0   ;;  %s2083_s27 = smov 0  }
  0x1c   :  { %s2085_s28 = smov 0   ;;  %s2087_s29 = smov 0  }
  0x1d   :  { %s2089_s30 = smov 0   ;;  %s2091_s11 = smov 0  }
  0x1e   :  { %s2093_s12 = smov 0   ;;  %s2095_s13 = smov 0  }
  0x1f   :  { %s2097_s14 = smov 0   ;;  %s2099_s15 = smov 0  }
  0x20 LB: > { %2827 = sst [smem:[#allocation34_spill]] %s1925_s23  ;;  %s2140_s16 = sadd.s32 4294967295, %s1977_s15   ;;  %s1977_s15 = sphi %s2099_s15, %s38_s15   ;;  %s1973_s14 = sphi %s2097_s14, %s2929_s14   ;;  %s1969_s13 = sphi %s2095_s13, %s2928_s13   ;;  %s1965_s12 = sphi %s2093_s12, %s2920_s12   ;;  %s1961_s11 = sphi %s2091_s11, %s2927_s11   ;;  %s1957_s30 = sphi %s2089_s30, %s2919_s30   ;;  %s1953_s29 = sphi %s2087_s29, %s2918_s29   ;;  %s1949_s28 = sphi %s2085_s28, %s2917_s28   ;;  %s1945_s27 = sphi %s2083_s27, %s2926_s27   ;;  %s1941_s0 = sphi %s2081_s0, %s2925_s0   ;;  %s1937_s26 = sphi %s2079_s26, %s2915_s26   ;;  %s1933_s25 = sphi %s2077_s25, %s2924_s25   ;;  %s1929_s24 = sphi %s2075_s24, %s2923_s24   ;;  %s1925_s23 = sphi %s2073_s23, %s2913_s23  }
  0x21   : > { %2828 = sst [smem:[#allocation35_spill]] %s1929_s24  ;;  %s2776_s17 = sadd.s32 4294967294, %s1977_s15  }
  0x22   : > { %2829 = sst [smem:[#allocation36_spill]] %s1941_s0  ;;  %p70_p3 = scmp.ne.s32.totalorder %s1953_s29, %s1949_s28 }
  0x23   : > { %2830 = sst [smem:[#allocation37_spill]] %s1953_s29  ;;  %p2786_p4 = scmp.eq.s32.totalorder %s2140_s16, 0 }
  0x24   : > { %2831 = sst [smem:[#allocation38_spill]] %s1957_s30  ;;  %p164_p7 = scmp.ne.s32.totalorder %s1941_s0, %s1937_s26 }
  0x25   : > { %2832 = sst [smem:[#allocation39_spill]] %s1961_s11  ;;  %p2152_p6 = por %p2786_p4, %p70_p3 }
  0x26   : > { %2833 = sst [smem:[#allocation40_spill]] %s1965_s12  ;;  %p236_p8 = scmp.ne.s32.totalorder %s1933_s25, %s1929_s24 }
  0x27   : > { %2834 = sst [smem:[#allocation41_spill]] %s1973_s14  ;;  %p2162_p9 = por %p164_p7, %p2786_p4 }
  0x28   : > { %s2835_s19 = scalar_select %p2152_p6, 1, 0 }
  0x29   : > { %s2837_s21 = scalar_select %p2162_p9, 1, 0 }
  0x2a   : > { %2836 = sst [smem:[#allocation42_spill]] %s2835_s19  ;;  %p2787_p10 = scmp.eq.s32.totalorder %s2140_s16, 3 }
  0x2b   : > { %2838 = sst [smem:[#allocation43_spill]] %s2837_s21  ;;  %p242_p11 = scmp.ne.s32.totalorder %s1929_s24, %s1925_s23 }
  0x2c   : > { %p243_p12 = scmp.eq.s32.totalorder %s2776_s17, 3  ;;  %p2173_p13 = por %p2787_p10, %p236_p8 }
  0x2d   : > { %p1206_p0 = scmp.ge.s32.totalorder %s1977_s15, 1  ;;  %p302_p7 = scmp.lt.s32.totalorder %s1977_s15, 5 }
  0x2e   : > { %s2839_s22 = scalar_select %p2173_p13, 1, 0 }
  0x2f   : > { %p2178_p1 = por %p243_p12, %p242_p11  ;;  %p2184_p2 = por %p243_p12, %p70_p3 }
  0x30   : > { %2840 = sst [smem:[#allocation44_spill]] %s2839_s22  ;;  %p2189_p5 = pnand %p1206_p0, %p302_p7 }
  0x31   : > { %s2841_s26 = scalar_select %p2178_p1, 1, 0 }
  0x32   : > { %s2843_s20 = scalar_select %p2184_p2, 1, 0 }
  0x33   : > { %2842 = sst [smem:[#allocation45_spill]] %s2841_s26  ;;  %s1980_s17 = smov [#allocation14]  }
  0x34   : > { %2844 = sst [smem:[#allocation46_spill]] %s2843_s20  ;;  %s314_s23 = sshll.u32 %s1980_s17, 4  ;;  %s315_s23 = int_to_ptr.vmem [resolvable:$true] %s314_s23 }
  0x35   : > { %s2845_s18 = scalar_select %p2189_p5, 1, 0 }
  0x36   : > { %p1326_p8 = pneg %p2189_p5  ;;  %s1981_s28 = smov [#allocation15]  }
  0x37   : > { %2846 = sst [smem:[#allocation47_spill]] %s2845_s18  ;;  %s328_s26 = sshll.u32 %s1981_s28, 4  ;;  %s2201_s26 = int_to_ptr.vmem [resolvable:$true] %s328_s26 }
  0x38   : > { %p2197_p11 = pnand %p1326_p8, %p2786_p4  ;;  %s2848_s3 = sld [smem:[#allocation55_spill]] }
  0x3a   : > { %s2847_s8 = scalar_select %p2197_p11, 1, 0 }
  0x3b   : > { %p2211_p12 = pneg %p2197_p11 }
  0x3d   : > { %s2849_s17 = scalar_select %p2211_p12, 1, 0 }
  0x3e   : > { %s1541_s10 = scalar_lea.hbm %s2848_s3, 256 }
  0x3f   : > { %p1542_p3 = scmp.ne.s32.totalorder %s2848_s3, %s1541_s10  ;;  %p1548_p8 = scmp.lt.u32.totalorder %s1541_s10, %s2848_s3 }
  0x41   : > { %p1544_p0 = pnand %p2211_p12, %p1542_p3 }
  0x43   : > { %p1545_p7 = pneg %p1544_p0 }
  0x45   : > { %p1550_p4 = pnand %p1548_p8, %p1545_p7 }
  0x47   : > { %1553 = shalt.err (!%p1550_p4)
}
  0x48   : > { %s1554_s20 = scalar_lea.vmem %s315_s23, 256  ;;  %p1562_p13 = scmp.lt.s32.totalorder %s315_s23, %s315_s23 }
  0x49   : > { %p1555_p10 = scmp.ne.s32.totalorder %s315_s23, %s1554_s20  ;;  %p1563_p9 = scmp.lt.s32.totalorder %s1554_s20, %s1554_s20 }
  0x4b   : > { %p1557_p2 = pnand %p1555_p10, %p2211_p12  ;;  %p1564_p6 = por %p1563_p9, %p1562_p13 }
  0x4d   : > { %p1558_p1 = pneg %p1557_p2 }
  0x4f   : > { %p1565_p5 = pnand %p1564_p6, %p1558_p1 }
  0x51   : > { %1568 = shalt.err (!%p1565_p5)
}
  0x52   : > { %s2799_s9 = smov 64   ;;  %s2801_s12 = smov 4  }
  0x53   : > { %1329 = dma.hbm_to_vmem [thread:$0]  (!%p2197_p11), %s2848_s3, 256, %s315_s23, [#allocation13], %s2799_s9, %s2799_s9, %s2801_s12  }
  0x54   : > { %s2850_s4 = sld [smem:[#allocation56_spill]] }
  0x5a   : > { %s1569_s24 = scalar_lea.hbm %s2850_s4, 16 }
  0x5b   : > { %p1570_p4 = scmp.ne.s32.totalorder %s2850_s4, %s1569_s24  ;;  %p1576_p9 = scmp.lt.u32.totalorder %s1569_s24, %s2850_s4 }
  0x5d   : > { %p1572_p5 = pnand %p1570_p4, %p2211_p12 }
  0x5f   : > { %p1573_p6 = pneg %p1572_p5 }
  0x61   : > { %p1578_p10 = pnand %p1576_p9, %p1573_p6 }
  0x63   : > { %1581 = shalt.err (!%p1578_p10)
}
  0x64   : > { %s1582_s23 = scalar_lea.vmem %s2201_s26, 16  ;;  %s1589_s21 = scalar_lea.vmem %s2201_s26, 32 }
  0x65   : > { %p1583_p13 = scmp.ne.s32.totalorder %s2201_s26, %s1582_s23  ;;  %p1590_p3 = scmp.lt.s32.totalorder %s2201_s26, %s2201_s26 }
  0x66   : > { %p1591_p0 = scmp.lt.s32.totalorder %s1589_s21, %s1582_s23 }
  0x67   : > { %p1585_p1 = pnand %p1583_p13, %p2211_p12 }
  0x68   : > { %p1592_p7 = por %p1591_p0, %p1590_p3 }
  0x69   : > { %p1586_p2 = pneg %p1585_p1 }
  0x6b   : > { %p1593_p8 = pnand %p1592_p7, %p1586_p2 }
  0x6d   : > { %1596 = shalt.err (!%p1593_p8)
}
  0x6e   : > { %1332 = dma.hbm_to_vmem [thread:$0]  (!%p2197_p11), %s2850_s4, 16, %s2201_s26, [#allocation16]  }
  0x6f   : > { %s47_s19 = sadd.s32 1, %s1969_s13  ;;  %s50_s10 = sadd.s32 1, %s1973_s14 }
  0x70   : > { %p48_p4 = scmp.ge.s32.totalorder %s47_s19, 2  ;;  %s57_s11 = sadd.s32 1, %s1957_s30 }
  0x71   : > { %p64_p5 = scmp.ne.s32.totalorder %s1957_s30, %s1953_s29  ;;  %p65_p6 = scmp.eq.s32.totalorder %s1977_s15, 0 }
  0x72   : > { %s2931_s19 = smov (%p48_p4, %s47_s19), 0  ;;  %s2933_s10 = smov (!%p48_p4, %s50_s10), %s1973_s14 }
  0x73   : > { %2851 = sst [smem:[#allocation48_spill]] %s2931_s19  ;;  %s148_s22 = ssub.s32 %s1969_s13, %s2931_s19 }
  0x74   : > { %p52_p9 = scmp.ge.s32.totalorder %s2933_s10, 2  ;;  %p149_p10 = scmp.eq.s32.totalorder %s148_s22, 0 }
  0x75   : > { %p2265_p13 = por %p65_p6, %p64_p5  ;;  %p2853_p1 = scmp.ne.s32.totalorder %s1945_s27, %s1941_s0 }
  0x76   : > { %s2935_s10 = smov (%p52_p9, %s2933_s10), 0  ;;  %s2856_s20 = sadd.s32 1, %s1945_s27 }
  0x77   : > { %p2272_p2 = por %p2853_p1, %p65_p6  ;;  %2855 = sst [smem:[#allocation49_spill]] %s2935_s10 }
  0x78   : > { %s2281_s23 = scalar_select %p149_p10, %s1945_s27, %s2856_s20  }
  0x79   : > { %s54_s21 = ssub.s32 %s1973_s14, %s2935_s10  ;;  %p2858_p3 = scmp.eq.s32.totalorder %s2140_s16, 3 }
  0x7a   : > { %2857 = sst [smem:[#allocation50_spill]] %s2281_s23  ;;  %p55_p7 = scmp.eq.s32.totalorder %s54_s21, 0 }
  0x7b   : > { %p2287_p0 = por %p2858_p3, %p64_p5  ;;  %s223_s18 = sor.u32 %s148_s22, %s54_s21 }
  0x7c   : > { %p224_p8 = scmp.eq.s32.totalorder %s223_s18, 0  ;;  %p2807_p4 = scmp.lt.s32.totalorder %s1977_s15, 4 }
  0x7d   : > { %s2859_s24 = scalar_select %p2287_p0, 1, 0 }
  0x7e   : > { %s2293_s9 = scalar_select %p55_p7, %s1957_s30, %s57_s11  }
  0x7f   : > { %s2861_s12 = sadd.s32 1, %s1933_s25  ;;  %s2812_s20 = sand.u32 1, %s1977_s15  }
  0x80   : > { %2860 = sst [smem:[#allocation51_spill]] %s2293_s9  ;;  %s352_s4 = sand.u32 1, %s1957_s30  }
  0x81   : > { %s2298_s3 = scalar_select %p224_p8, %s1933_s25, %s2861_s12  }
  0x82   : > { %s1211_s10 = sshll.u32 %s352_s4, 3  ;;  %s1260_s19 = sshll.u32 %s1973_s14, 7 }
  0x83   : > { %2862 = sst [smem:[#allocation52_spill]] %s2298_s3  ;;  %s2863_s1 = sld [smem:[#allocation53_spill]] }
  0x84   : > { %s354_s22 = scalar_lea.vmem [#allocation9], %s1211_s10  ;;  %p2314_p5 = pnand %p2807_p4, %p2265_p13 }
  0x85   : > { %s361_s21 = sshll.u32 %s354_s22, 4  ;;  %s2318_s11 = sshll.u32 %s352_s4, 4  ;;  %s2308_s21 = int_to_ptr.vmem [resolvable:$true] %s361_s21 }
  0x86   : > { %s2322_s0 = scalar_lea.sflag [#allocation10], %s2812_s20  ;;  %p1599_p9 = pneg %p2314_p5 }
  0x89   : > { %s2306_s29 = scalar_lea.hbm %s2863_s1, %s1260_s19  ;;  %s1602_s23 = scalar_lea.hbm %s2863_s1, 256 }
  0x8a   : > { %s1597_s19 = scalar_lea.hbm %s2306_s29, 128  ;;  %p1603_p13 = scmp.lt.u32.totalorder %s2306_s29, %s2863_s1 }
  0x8b   : > { %p1598_p6 = scmp.ne.s32.totalorder %s2306_s29, %s1597_s19  ;;  %p1604_p3 = scmp.lt.u32.totalorder %s1602_s23, %s1597_s19 }
  0x8c   : > { %p1606_p8 = scmp.lt.u32.totalorder %s1597_s19, %s2306_s29 }
  0x8d   : > { %p1600_p10 = pnand %p1599_p9, %p1598_p6  ;;  %p1605_p7 = por %p1604_p3, %p1603_p13 }
  0x8f   : > { %p1601_p1 = pneg %p1600_p10  ;;  %p1607_p4 = por %p1606_p8, %p1605_p7 }
  0x91   : > { %p1608_p0 = pnand %p1607_p4, %p1601_p1 }
  0x93   : > { %1611 = shalt.err (!%p1608_p0)
}
  0x94   : > { %s1612_s4 = scalar_lea.vmem %s2308_s21, 128  ;;  %s1984_s10 = smov [#allocation9]  }
  0x95   : > { %p1613_p6 = scmp.ne.s32.totalorder %s2308_s21, %s1612_s4  ;;  %s1617_s26 = sshll.u32 %s1984_s10, 4  ;;  %s1618_s26 = int_to_ptr.vmem [resolvable:$false] %s1617_s26 }
  0x96   : > { %s1619_s18 = scalar_lea.vmem %s1618_s26, 256  ;;  %p1620_p12 = scmp.lt.s32.totalorder %s2308_s21, %s1618_s26 }
  0x97   : > { %p1615_p10 = pnand %p1613_p6, %p1599_p9  ;;  %p1621_p13 = scmp.lt.s32.totalorder %s1619_s18, %s1612_s4 }
  0x99   : > { %p1616_p11 = pneg %p1615_p10  ;;  %p1622_p3 = por %p1621_p13, %p1620_p12 }
  0x9b   : > { %p1623_p7 = pnand %p1622_p3, %p1616_p11 }
  0x9d   : > { %1626 = shalt.err (!%p1623_p7)
}
  0x9e   : > { %s2865_s19 = smov 4   ;;  %s2866_s23 = smov 64  }
  0x9f   : > { %1339 = dma.hbm_to_vmem [thread:$0]  (!%p2314_p5), %s2306_s29, 128, %s2308_s21, %s2322_s0, %s2866_s23, %s2866_s23, %s2865_s19  }
  0xa0   : > { %s375_s22 = scalar_lea.vmem [#allocation12], %s2318_s11  ;;  %p2867_p11 = scmp.lt.s32.totalorder %s1977_s15, 4 }
  0xa1   : > { %s382_s4 = sshll.u32 %s375_s22, 4  ;;  %s1261_s26 = sshll.u32 %s1973_s14, 8  ;;  %s2363_s4 = int_to_ptr.vmem [resolvable:$true] %s382_s4 }
  0xa2   : > { %p2358_p12 = pnand %p2867_p11, %p2272_p2  ;;  %s2869_s2 = sld [smem:[#allocation54_spill]] }
  0xa3   : > { %s2870_s9 = sand.u32 1, %s1977_s15  }
  0xa4   : > { %s2372_s29 = scalar_lea.sflag [#allocation13], %s2870_s9 }
  0xa8   : > { %s2368_s1 = scalar_lea.hbm %s2869_s2, %s1261_s26  ;;  %s1632_s22 = scalar_lea.hbm %s2869_s2, 512 }
  0xa9   : > { %s1627_s28 = scalar_lea.hbm %s2368_s1, 256  ;;  %p1633_p1 = scmp.lt.u32.totalorder %s2368_s1, %s2869_s2 }
  0xaa   : > { %p1628_p2 = scmp.ne.s32.totalorder %s2368_s1, %s1627_s28  ;;  %p1634_p8 = scmp.lt.u32.totalorder %s1632_s22, %s1627_s28 }
  0xab   : > { %p1636_p10 = scmp.lt.u32.totalorder %s1627_s28, %s2368_s1 }
  0xac   : > { %p1630_p0 = pnand %p1628_p2, %p1599_p9  ;;  %p1635_p6 = por %p1634_p8, %p1633_p1 }
  0xae   : > { %p1631_p4 = pneg %p1630_p0  ;;  %p1637_p13 = por %p1636_p10, %p1635_p6 }
  0xb0   : > { %p1638_p3 = pnand %p1637_p13, %p1631_p4 }
  0xb2   : > { %1641 = shalt.err (!%p1638_p3)
}
  0xb3   : > { %s1642_s9 = scalar_lea.vmem %s2363_s4, 256  ;;  %s1985_s18 = smov [#allocation12]  }
  0xb4   : > { %p1643_p7 = scmp.ne.s32.totalorder %s2363_s4, %s1642_s9  ;;  %s1647_s21 = sshll.u32 %s1985_s18, 4  ;;  %s1648_s21 = int_to_ptr.vmem [resolvable:$false] %s1647_s21 }
  0xb5   : > { %s1649_s11 = scalar_lea.vmem %s1648_s21, 512  ;;  %p1650_p0 = scmp.lt.s32.totalorder %s2363_s4, %s1648_s21 }
  0xb6   : > { %p1645_p11 = pnand %p1643_p7, %p1599_p9  ;;  %p1651_p1 = scmp.lt.s32.totalorder %s1649_s11, %s1642_s9 }
  0xb8   : > { %p1646_p2 = pneg %p1645_p11  ;;  %p1652_p8 = por %p1651_p1, %p1650_p0 }
  0xba   : > { %p1653_p6 = pnand %p1652_p8, %p1646_p2 }
  0xbc   : > { %1656 = shalt.err (!%p1653_p6)
}
  0xbd   : > { %s1986_s28 = smov 128   ;;  %s1987_s22 = smov 8  }
  0xbe   : > { %1342 = dma.hbm_to_vmem [thread:$0]  (!%p2314_p5), %s2368_s1, 256, %s2363_s4, %s2372_s29, %s1986_s28, %s1986_s28, %s1987_s22  }
  0xbf   : > { %s394_s20 = sand.u32 1, %s1945_s27   ;;  %s1988_s26 = smov [#allocation19]  }
  0xc0   : > { %s339_s18 = sshll.u32 %s1988_s26, 4  ;;  %s1217_s9 = sshll.u32 %s394_s20, 5  ;;  %s340_s18 = int_to_ptr.vmem [resolvable:$true] %s339_s18 }
  0xc1   : > { %s2871_s7 = sld [smem:[#allocation59_spill]]  ;;  %p2872_p4 = scmp.ne.s32.totalorder %s2849_s17, 0 }
  0xc7   : > { %s1657_s2 = scalar_lea.hbm %s2871_s7, 16 }
  0xc8   : > { %p1658_p9 = scmp.ne.s32.totalorder %s2871_s7, %s1657_s2  ;;  %p1664_p5 = scmp.lt.u32.totalorder %s1657_s2, %s2871_s7 }
  0xca   : > { %p1660_p10 = pnand %p1658_p9, %p2872_p4 }
  0xcc   : > { %p1661_p13 = pneg %p1660_p10 }
  0xce   : > { %p1666_p3 = pnand %p1664_p5, %p1661_p13 }
  0xd0   : > { %1669 = shalt.err (!%p1666_p3)
}
  0xd1   : > { %s1670_s1 = scalar_lea.vmem %s340_s18, 16  ;;  %s1677_s4 = scalar_lea.vmem %s340_s18, 32 }
  0xd2   : > { %p1671_p7 = scmp.ne.s32.totalorder %s340_s18, %s1670_s1  ;;  %p1678_p0 = scmp.lt.s32.totalorder %s340_s18, %s340_s18 }
  0xd3   : > { %p1679_p1 = scmp.lt.s32.totalorder %s1677_s4, %s1670_s1 }
  0xd4   : > { %p1673_p11 = pnand %p1671_p7, %p2872_p4 }
  0xd5   : > { %p1680_p8 = por %p1679_p1, %p1678_p0 }
  0xd6   : > { %p1674_p2 = pneg %p1673_p11 }
  0xd8   : > { %p1681_p6 = pnand %p1680_p8, %p1674_p2 }
  0xda   : > { %1684 = shalt.err (!%p1681_p6)
}
  0xdb   : > { %p2873_p9 = scmp.ne.s32.totalorder %s2847_s8, 0  ;;  %s1218_s2 = sshll.u32 %s1969_s13, 6 }
  0xdc   : > { %s396_s3 = scalar_lea.vmem [#allocation17], %s1217_s9  ;;  %s2874_s5 = sld [smem:[#allocation57_spill]] }
  0xdd   : > { %1335 = dma.hbm_to_vmem [thread:$0]  (!%p2873_p9), %s2871_s7, 16, %s340_s18, [#allocation16]  }
  0xde   : > { %s402_s17 = sshll.u32 %s396_s3, 4  ;;  %p1687_p10 = pneg %p2358_p12  ;;  %s2427_s17 = int_to_ptr.vmem [resolvable:$true] %s402_s17 }
  0xe2   : > { %s2425_s21 = scalar_lea.hbm %s2874_s5, %s1218_s2  ;;  %s1690_s11 = scalar_lea.hbm %s2874_s5, 1024 }
  0xe3   : > { %s1685_s8 = scalar_lea.hbm %s2425_s21, 512  ;;  %p1691_p3 = scmp.lt.u32.totalorder %s2425_s21, %s2874_s5 }
  0xe4   : > { %p1686_p4 = scmp.ne.s32.totalorder %s2425_s21, %s1685_s8  ;;  %p1692_p7 = scmp.lt.u32.totalorder %s1690_s11, %s1685_s8 }
  0xe5   : > { %p1694_p2 = scmp.lt.u32.totalorder %s1685_s8, %s2425_s21 }
  0xe6   : > { %p1688_p13 = pnand %p1687_p10, %p1686_p4  ;;  %p1693_p11 = por %p1692_p7, %p1691_p3 }
  0xe8   : > { %p1689_p5 = pneg %p1688_p13  ;;  %p1695_p0 = por %p1694_p2, %p1693_p11 }
  0xea   : > { %p1696_p1 = pnand %p1695_p0, %p1689_p5 }
  0xec   : > { %1699 = shalt.err (!%p1696_p1)
}
  0xed   : > { %s1700_s4 = scalar_lea.vmem %s2427_s17, 512  ;;  %s1989_s30 = smov [#allocation17]  }
  0xee   : > { %p1701_p8 = scmp.ne.s32.totalorder %s2427_s17, %s1700_s4  ;;  %s1705_s14 = sshll.u32 %s1989_s30, 4  ;;  %s1706_s14 = int_to_ptr.vmem [resolvable:$false] %s1705_s14 }
  0xef   : > { %s1707_s2 = scalar_lea.vmem %s1706_s14, 1024  ;;  %p1708_p4 = scmp.lt.s32.totalorder %s2427_s17, %s1706_s14 }
  0xf0   : > { %p1703_p6 = pnand %p1701_p8, %p1687_p10  ;;  %p1709_p13 = scmp.lt.s32.totalorder %s1707_s2, %s1700_s4 }
  0xf2   : > { %p1704_p9 = pneg %p1703_p6  ;;  %p1710_p3 = por %p1709_p13, %p1708_p4 }
  0xf4   : > { %p1711_p7 = pnand %p1710_p3, %p1704_p9 }
  0xf6   : > { %1714 = shalt.err (!%p1711_p7)
}
  0xf7   : > { %1345 = dma.hbm_to_vmem [thread:$0]  (!%p2358_p12), %s2425_s21, 512, %s2427_s17, %s2322_s0, %s1986_s28, %s2866_s23, %s2865_s19  }
  0xf8   : > { %s1219_s3 = sshll.u32 %s1969_s13, 4  ;;  %s2875_s6 = sld [smem:[#allocation58_spill]] }
  0xf9   : > { %s415_s18 = scalar_lea.vmem [#allocation18], %s394_s20 }
  0xfa   : > { %s422_s9 = sshll.u32 %s415_s18, 4  ;;  %s423_s9 = int_to_ptr.vmem [resolvable:$true] %s422_s9 }
  0xfe   : > { %s2462_s8 = scalar_lea.hbm %s2875_s6, %s1219_s3  ;;  %s1720_s23 = scalar_lea.hbm %s2875_s6, 32 }
  0xff   : > { %s1715_s11 = scalar_lea.hbm %s2462_s8, 16  ;;  %p1721_p0 = scmp.lt.u32.totalorder %s2462_s8, %s2875_s6 }
 0x100   : > { %p1716_p5 = scmp.ne.s32.totalorder %s2462_s8, %s1715_s11  ;;  %p1722_p1 = scmp.lt.u32.totalorder %s1720_s23, %s1715_s11 }
 0x101   : > { %p1724_p6 = scmp.lt.u32.totalorder %s1715_s11, %s2462_s8 }
 0x102   : > { %p1718_p11 = pnand %p1716_p5, %p1687_p10  ;;  %p1723_p8 = por %p1722_p1, %p1721_p0 }
 0x104   : > { %p1719_p2 = pneg %p1718_p11  ;;  %p1725_p9 = por %p1724_p6, %p1723_p8 }
 0x106   : > { %p1726_p4 = pnand %p1725_p9, %p1719_p2 }
 0x108   : > { %1729 = shalt.err (!%p1726_p4)
}
 0x109   : > { %s1730_s20 = scalar_lea.vmem %s423_s9, 16  ;;  %s1990_s21 = smov [#allocation18]  }
 0x10a   : > { %p1731_p13 = scmp.ne.s32.totalorder %s423_s9, %s1730_s20  ;;  %s1735_s12 = sshll.u32 %s1990_s21, 4  ;;  %s1736_s12 = int_to_ptr.vmem [resolvable:$false] %s1735_s12 }
 0x10b   : > { %s1737_s1 = scalar_lea.vmem %s1736_s12, 32  ;;  %p1738_p5 = scmp.lt.s32.totalorder %s423_s9, %s1736_s12 }
 0x10c   : > { %p1733_p3 = pnand %p1731_p13, %p1687_p10  ;;  %p1739_p11 = scmp.lt.s32.totalorder %s1737_s1, %s1730_s20 }
 0x10e   : > { %p1734_p7 = pneg %p1733_p3  ;;  %p1740_p0 = por %p1739_p11, %p1738_p5 }
 0x110   : > { %p1741_p1 = pnand %p1740_p0, %p1734_p7 }
 0x112   : > { %1744 = shalt.err (!%p1741_p1)
}
 0x113   : > { %1348 = dma.hbm_to_vmem [thread:$0]  (!%p2358_p12), %s2462_s8, 16, %s423_s9, %s2372_s29  }
 0x114   : > { %s2876_s4 = sld [smem:[#allocation47_spill]] }
 0x11a   : > { %p2877_p2 = scmp.ne.s32.totalorder %s2876_s4, 0 }
 0x11b   : > { %s2878_s30 = sld [smem:[#allocation37_spill]] (!%p2877_p2)  ;;  %s2879_s14 = sld [smem:[#allocation42_spill]] (!%p2877_p2) }
 0x11c   : > { %431 = sbr.rel (%p2877_p2) target bundleno = 1644 (0x66c), region = 48  ;;  %s2489_s2 = sand.u32 (!%p2877_p2), 1, %s2140_s16  }
 0x11d   : > { %s434_s26 = scalar_lea.sflag (!%p2877_p2), [#allocation10], %s2489_s2 }
 0x121   : > { %s435_s3 = sand.u32 (!%p2877_p2), 1, %s2878_s30   ;;  %p2880_p10 = scmp.ne.s32.totalorder (!%p2877_p2), %s2879_s14, 0 }
 0x122   : > { %s2492_s22 = sshll.u32 (!%p2877_p2), %s435_s3, 3 }
 0x123   : > { %s437_s18 = scalar_lea.vmem [#allocation9], %s2492_s22 }
 0x124   : > { %1888 = dma.done.wait (%p2880_p10), %s434_s26, 128  }
 0x125   : > { %1890 = vsyncadd (%p2880_p10), %s434_s26, 4294967168  ;;  %s1222_s10 = sshll.u32 %s435_s3, 4  ;;  %s443_s29 = scalar_lea.sflag [#allocation13], %s2489_s2 }
 0x126   : > { %s2501_s8 = scalar_lea.vmem [#allocation12], %s1222_s10 }
 0x127   : > { %1892 = dma.done.wait (%p2880_p10), %s443_s29, 256  }
 0x128   : > { %1894 = vsyncadd (%p2880_p10), %s443_s29, 4294967040  ;;  %p2881_p12 = scmp.eq.s32.totalorder %s2140_s16, 0 }
 0x12a   : > { %1896 = dma.done.wait (%p2881_p12), [#allocation13], 256   ;;  %p2882_p8 = pmov %p2881_p12 }
 0x12c   : > { %1898 = vsyncadd (%p2882_p8), [#allocation13], 4294967040  ;;  %p2883_p6 = pmov %p2882_p8 }
 0x12e   : > { %1900 = dma.done.wait (%p2883_p6), [#allocation16], 16   ;;  %p2884_p9 = pmov %p2883_p6 }
 0x12f   : > { %s2885_s9 = sld [smem:[#allocation36_spill]]  ;;  %s2886_s11 = sld [smem:[#allocation43_spill]] }
 0x130   : > { %1902 = vsyncadd (%p2884_p9), [#allocation16], 4294967280 }
 0x135   : > { %s461_s0 = sand.u32 1, %s2885_s9   ;;  %p2887_p4 = scmp.ne.s32.totalorder %s2886_s11, 0 }
 0x136   : > { %s1225_s19 = sshll.u32 %s461_s0, 5 }
 0x137   : > { %s2516_s23 = scalar_lea.vmem [#allocation17], %s1225_s19 }
 0x138   : > { %1904 = dma.done.wait (%p2887_p4), %s434_s26, 512  }
 0x139   : > { %1906 = vsyncadd (%p2887_p4), %s434_s26, 4294966784  ;;  %s2522_s28 = scalar_lea.vmem [#allocation18], %s461_s0 }
 0x13a   : > { %1908 = dma.done.wait (%p2887_p4), %s443_s29, 16  }
 0x13b   : > { %1910 = vsyncadd (%p2887_p4), %s443_s29, 4294967280  ;;  %p2888_p13 = pmov %p2883_p6 }
 0x13c   : > { %p2889_p3 = pmov %p2883_p6 }
 0x13d   : > { %1912 = dma.done.wait (%p2888_p13), [#allocation16], 16  }
 0x13e   : > { %1914 = vsyncadd (%p2889_p3), [#allocation16], 4294967280  ;;  %s2890_s17 = sld [smem:[#allocation35_spill]]  ;;  %s2538_s1 = scalar_lea.vmem [#allocation21], %s1222_s10 }
 0x13f   : > { %s2540_s4 = scalar_lea.vmem [#allocation23], %s1222_s10  ;;  %s2891_s30 = sld [smem:[#allocation39_spill]] }
 0x144   : > { %s2815_s20 = sand.u32 1, %s2890_s17  }
 0x145   : > { %s2535_s21 = sshll.u32 %s2815_s20, 3  ;;  %p1230_p7 = scmp.ne.s32.totalorder %s2891_s30, 0 }
 0x146   : > { %s519_s12 = scalar_lea.vmem [#allocation20], %s2535_s21  ;;  %vm626_vm0 = vcmask (!%p1230_p7), 7168   ;;  %v1499_v0 = vld [vmem:[#allocation14] sm:$0xff] (!%p1230_p7)   ;;  %v1991_v1 = vmov (!%p1230_p7), 0.0   ;;  %v1992_v2 = vmov (!%p1230_p7), -inf   ;;  %v1500_v3 = vld [vmem:[#allocation14 + $0x8] sm:$0xff] (!%p1230_p7)  }
 0x147   : > { %543 = sbr.rel (%p1230_p7) target bundleno = 565 (0x235), region = 80  ;;  %1280 = vmatprep.subr.bf16.mxu0 (!%p1230_p7), %v1991_v1  ;;  %627 = vst.msk [vmem:[#allocation3] sm:$0xff] (!%p1230_p7), %vm626_vm0, %v1992_v2  ;;  %628 = vst.msk [vmem:[#allocation3 + $0x8] sm:$0xff] (!%p1230_p7), %vm626_vm0, %v1992_v2  ;;  %vm1993_vm1 = vmmov (!%p1230_p7), 0   ;;  %v1501_v4 = vld [vmem:[%s437_s18] sm:$0xff] (!%p1230_p7)   ;;  %vm574_vm2 = vcmask (!%p1230_p7), 261120  }
 0x148   : > { %629 = vst.msk [vmem:[#allocation4] sm:$0xff] (!%p1230_p7), %vm626_vm0, %v1991_v1  ;;  %630 = vst.msk [vmem:[#allocation4 + $0x8] sm:$0xff] (!%p1230_p7), %vm626_vm0, %v1991_v1  ;;  %1281 = vmatpush3.bf16.msra.mxu0 (!%p1230_p7), %v1499_v0  ;;  %1284 = vmatprep.mubr.msk.bf16.mxu0 (!%p1230_p7), %vm1993_vm1, %v1991_v1  ;;  %v1231_v5 = vld [vmem:[#allocation15] ss:$0 sm:$0xff] (!%p1230_p7)  ;;  %vm621_vm3 = vcmask (!%p1230_p7), 523264  }
 0x149   : > { %631 = vst.msk [vmem:[#allocation5] sm:$0xff] (!%p1230_p7), %vm626_vm0, %v1991_v1  ;;  %632 = vst.msk [vmem:[#allocation5 + $0x8] sm:$0xff] (!%p1230_p7), %vm626_vm0, %v1991_v1  ;;  %1282 = vmatprep.subr.bf16.mxu0 (!%p1230_p7), %v1991_v1 }
 0x14a   : > { %633 = vst.msk [vmem:[#allocation6] sm:$0xff] (!%p1230_p7), %vm626_vm0, %v1991_v1  ;;  %634 = vst.msk [vmem:[#allocation6 + $0x8] sm:$0xff] (!%p1230_p7), %vm626_vm0, %v1991_v1 }
 0x14c   : > { %1283 = vmatpush3.bf16.msra.mxu0 (!%p1230_p7), %v1500_v3 }
 0x14f   : > { %1285 = vmatmul.mubr.msk.bf16.vlgmr.msra.gmra.mrb[0].mxu0 %vm574_vm2, %v1501_v4 }
 0x222   : > { %v612_v6 = vpop.f32.mrb[0].mxu0 }
 0x223   : > { %v613_v7 = vadd.f32 %v1231_v5, %v612_v6  ;;  %v1286_v8 = vpop.f32.mrb[1].mxu0 }
 0x224   : > { %v615_v9 = vpop.f32.mrb[2].mxu0 }
 0x225   : > { %1502 = vtanh.f32 %v613_v7  ;;  %v616_v10 = vadd.f32 %v1231_v5, %v615_v9  ;;  %v1287_v11 = vpop.f32.mrb[3].mxu0 }
 0x227   : > { %1504 = vtanh.f32 %v616_v10 }
 0x22f   : > { %v1503_v12 = vpop.eup %1502 }
 0x230   : > { %622 = vst.msk [vmem:[%s2538_s1] sm:$0xff] %vm621_vm3, %v1503_v12 }
 0x231   : > { %v1505_v13 = vpop.eup %1504 }
 0x232   : > { %623 = vst.msk [vmem:[%s2538_s1 + $0x8] sm:$0xff] %vm621_vm3, %v1505_v13  ;;  %v624_v14 = vpack.c.bf16 %v1505_v13, %v1503_v12 }
 0x234   : > { %625 = vst.msk [vmem:[#allocation2] sm:$0xff] %vm621_vm3, %v624_v14 }
 0x235 PF: > { %v1508_v15 = vld [vmem:[%s2516_s23] sm:$0xff]   ;;  %v1994_v16 = vmov 0.0   ;;  %v1509_v17 = vld [vmem:[%s2516_s23 + $0x8] sm:$0xff]   ;;  %vm1995_vm4 = vmmov 0   ;;  %v1510_v18 = vld [vmem:[%s2516_s23 + $0x10] sm:$0xff]   ;;  %vm675_vm5 = vcmask 523264  }
 0x236   : > { %1288 = vmatprep.subr.bf16.mxu0 %v1994_v16  ;;  %1296 = vmatprep.mubr.msk.bf16.mxu0 %vm1995_vm4, %v1994_v16  ;;  %v1511_v19 = vld [vmem:[%s2516_s23 + $0x18] sm:$0xff]   ;;  %v1236_v21 = vld [vmem:[%s2522_s28] ss:$0 sm:$0xff]  ;;  %v1996_v31 = vmov 0   ;;  %vm772_vm6 = vcmask 7168   ;;  %v737_v35 = vld [vmem:[#allocation3 + $0x8] sm:$0xff] }
 0x237   : > { %1289 = vmatpush3.bf16.msra.mxu0 %v1508_v15  ;;  %1506 = vset.pattern.permute.xlu1 %v1996_v31  ;;  %v736_v32 = vld [vmem:[#allocation3] sm:$0xff]  ;;  %s2892_s16 = sld [smem:[#allocation40_spill]]  ;;  %s2893_s14 = sld [smem:[#allocation39_spill]]  ;;  %v762_v53 = vld [vmem:[#allocation4] sm:$0xff]  ;;  %v763_v57 = vld [vmem:[#allocation4 + $0x8] sm:$0xff] }
 0x238   : > { %1290 = vmatprep.subr.bf16.mxu0 %v1994_v16  ;;  %1507 = vset.pattern.permute.xlu0 %v1996_v31  ;;  %v775_v58 = vld [vmem:[#allocation5] sm:$0xff]  ;;  %v776_v0 = vld [vmem:[#allocation5 + $0x8] sm:$0xff] }
 0x23b   : > { %1291 = vmatpush3.bf16.msra.mxu0 %v1509_v17  ;;  %v635_v20 = vld [vmem:[#allocation2] sm:$0xff] }
 0x23c   : > { %1292 = vmatprep.subr.bf16.mxu0 %v1994_v16 }
 0x23d   : > { %s1245_s3 = sshll.u32 %s2892_s16, 7  ;;  %s2569_s10 = sshll.u32 %s2893_s14, 7 }
 0x23e   : > { %s794_s22 = sadd.s32 1, %s1245_s3  ;;  %s793_s26 = sld [smem:[#allocation8 + %s1245_s3]] }
 0x23f   : > { %1293 = vmatpush3.bf16.msra.mxu0 %v1510_v18  ;;  %s795_s18 = sld [smem:[#allocation8 + %s794_s22]]  ;;  %s797_s29 = sadd.s32 128, %s2569_s10 }
 0x240   : > { %1294 = vmatprep.subr.bf16.mxu0 %v1994_v16 }
 0x243   : > { %1295 = vmatpush3.bf16.msra.mxu0 %v1511_v19 }
 0x244   : > { %p798_p11 = scmp.lt.s32.totalorder %s793_s26, %s797_s29 }
 0x245   : > { %p796_p5 = scmp.ge.s32.totalorder %s795_s18, %s2569_s10 }
 0x246   : > { %1297 = vmatmul.mubr.msk.bf16.vlgmr.msra.gmra.mrb[0].mxu0 %vm675_vm5, %v635_v20 }
 0x247   : > { %p2573_p0 = pnand %p798_p11, %p796_p5 }
 0x248   : > { %v803_v6 = vld [vmem:[%s2501_s8] sm:$0xff] (!%p2573_p0)  ;;  %v1997_v7 = vmov (!%p2573_p0), 0   ;;  %v804_v8 = vld [vmem:[%s2501_s8 + $0x8] sm:$0xff] (!%p2573_p0)  ;;  %v805_v9 = vlaneseq (!%p2573_p0)  ;;  %v807_v11 = vstv (!%p2573_p0), %s2569_s10 }
 0x249   : > { %1520 = vset.pattern.permute.xlu0 (!%p2573_p0), %v1997_v7  ;;  %v809_v17 = vld [vmem:[#allocation6] sm:$0xff] (!%p2573_p0)  ;;  %v810_v20 = vld [vmem:[#allocation6 + $0x8] sm:$0xff] (!%p2573_p0) }
 0x24a   : > { %v806_v10 = vand.u32 (!%p2573_p0), 127, %v805_v9 }
 0x24c   : > { %v808_v12 = vadd.s32 (!%p2573_p0), %v807_v11, %v806_v10 }
 0x319   : > { %v713_v22 = vpop.f32.mrb[0].mxu0 }
 0x31a   : > { %v714_v23 = vadd.f32 %v1236_v21, %v713_v22  ;;  %v1298_v24 = vpop.f32.mrb[1].mxu0 }
 0x31b   : > { %v716_v25 = vpop.f32.mrb[2].mxu0 }
 0x31c   : > { %v2553_v26 = vmul.f32 1.4285715, %v714_v23  ;;  %v717_v27 = vadd.f32 %v1236_v21, %v716_v25  ;;  %v1299_v28 = vpop.f32.mrb[3].mxu0 }
 0x31e   : > { %v1270_v29 = vpack.c.bf16 %v717_v27, %v714_v23  ;;  %732 = vmax.xlane.f32.xlu0 %v2553_v26  ;;  %v2558_v30 = vmul.f32 1.4285715, %v717_v27 }
 0x320   : > { %1271 = vst [vmem:[%s519_s12] sm:$0xff] %v1270_v29  }
 0x322   : > { %734 = vmax.xlane.f32.xlu0 %v2558_v30 }
 0x3ab   : > { %v733_v33 = vpop.xlane.xlu0 %732 }
 0x3ac   : > { %v738_v34 = vmax.f32 %v736_v32, %v733_v33 }
 0x3ae   : > { %v740_v36 = vsub.f32 %v736_v32, %v738_v34  ;;  %789 = vst.msk [vmem:[#allocation3] sm:$0xff] %vm772_vm6, %v738_v34  ;;  %748 = vperm.xlu1 %1506, %v738_v34  }
 0x3af   : > { %v735_v37 = vpop.xlane.xlu0 %734 }
 0x3b0   : > { %v739_v38 = vmax.f32 %v737_v35, %v735_v37  ;;  %v742_v50 = vmul.f32 1.442695, %v740_v36 }
 0x3b2   : > { %v741_v39 = vsub.f32 %v737_v35, %v739_v38  ;;  %790 = vst.msk [vmem:[#allocation3 + $0x8] sm:$0xff] %vm772_vm6, %v739_v38  ;;  %753 = vperm.xlu1 %1506, %v739_v38  }
 0x3b4   : > { %v744_v51 = vmul.f32 1.442695, %v741_v39 }
 0x42d   : > { %v749_v40 = vpop.permute.xlu1 %748 }
 0x42e   : > { %v756_v41 = vsub.f32 %v2553_v26, %v749_v40 }
 0x430   : > { %v758_v42 = vmul.f32 1.442695, %v756_v41 }
 0x431   : > { %v754_v43 = vpop.permute.xlu1 %753 }
 0x432   : > { %1512 = vpow2.f32 %v758_v42  ;;  %v757_v44 = vsub.f32 %v2558_v30, %v754_v43 }
 0x434   : > { %v760_v45 = vmul.f32 1.442695, %v757_v44 }
 0x436   : > { %1514 = vpow2.f32 %v760_v45 }
 0x437   : > { %1516 = vpow2.f32 %v742_v50 }
 0x438   : > { %1518 = vpow2.f32 %v744_v51 }
 0x43c   : > { %v1513_v46 = vpop.eup %1512 }
 0x43d   : > { %766 = vadd.xlane.f32.xlu0 %v1513_v46  ;;  %v779_v47 = vmul.f32 %v1513_v46, %v2553_v26 }
 0x440   : > { %v1515_v48 = vpop.eup %1514 }
 0x441   : > { %781 = vadd.xlane.f32.xlu0 %v779_v47  ;;  %768 = vadd.xlane.f32.xlu1 %v1515_v48  ;;  %v780_v49 = vmul.f32 %v1515_v48, %v2558_v30  ;;  %v1517_v52 = vpop.eup %1516 }
 0x442   : > { %v764_v54 = vmul.f32 %v1517_v52, %v762_v53  ;;  %v1519_v55 = vpop.eup %1518  ;;  %v777_v61 = vmul.f32 %v1517_v52, %v775_v58 }
 0x443   : > { %v765_v60 = vmul.f32 %v1519_v55, %v763_v57  ;;  %v778_v3 = vmul.f32 %v1519_v55, %v776_v0 }
 0x445   : > { %783 = vadd.xlane.f32.xlu0 %v780_v49 }
 0x45b   : > { %812 = vperm.xlu0 (!%p2573_p0), %1520, %v803_v6  }
 0x45f   : > { %815 = vperm.xlu0 (!%p2573_p0), %1520, %v804_v8  }
 0x4ca   : > { %v767_v56 = vpop.xlane.xlu0 %766 }
 0x4cb   : > { %v770_v59 = vadd.f32 %v767_v56, %v764_v54 }
 0x4cd   : > { %773 = vst.msk [vmem:[#allocation4] sm:$0xff] %vm772_vm6, %v770_v59 }
 0x4ce   : > { %v769_v62 = vpop.xlane.xlu1 %768  ;;  %v782_v63 = vpop.xlane.xlu0 %781 }
 0x4cf   : > { %v771_v1 = vadd.f32 %v769_v62, %v765_v60  ;;  %v785_v2 = vadd.f32 %v782_v63, %v777_v61  ;;  %802 = sbr.rel (%p2573_p0) target bundleno = 1394 (0x572), region = 84 }
 0x4d1   : > { %774 = vst.msk [vmem:[#allocation4 + $0x8] sm:$0xff] %vm772_vm6, %v771_v1  ;;  %787 = vst.msk [vmem:[#allocation5] sm:$0xff] %vm772_vm6, %v785_v2 }
 0x4d2   : > { %v784_v4 = vpop.xlane.xlu0 %783 }
 0x4d3   : > { %v786_v5 = vadd.f32 %v784_v4, %v778_v3 }
 0x4d5   : > { %788 = vst.msk [vmem:[#allocation5 + $0x8] sm:$0xff] %vm772_vm6, %v786_v5 }
 0x4da   : > { %v813_v13 = vpop.permute.xlu0 %812 }
 0x4db   : > { %vm817_vm7 = vcmp.eq.s32.totalorder %v808_v12, %v813_v13 }
 0x4dc   : > { %v819_v14 = vsel %vm817_vm7, %v2553_v26, 0.0 }
 0x4dd   : > { %821 = vadd.xlane.f32.xlu1 %v819_v14 }
 0x4de   : > { %v816_v15 = vpop.permute.xlu0 %815 }
 0x4df   : > { %vm818_vm8 = vcmp.eq.s32.totalorder %v808_v12, %v816_v15 }
 0x4e0   : > { %v820_v16 = vsel %vm818_vm8, %v2558_v30, 0.0 }
 0x4e1   : > { %823 = vadd.xlane.f32.xlu1 %v820_v16 }
 0x56a   : > { %v822_v18 = vpop.xlane.xlu1 %821 }
 0x56b   : > { %v825_v19 = vadd.f32 %v822_v18, %v809_v17 }
 0x56d   : > { %827 = vst.msk [vmem:[#allocation6] sm:$0xff] %vm772_vm6, %v825_v19 }
 0x56e   : > { %v824_v21 = vpop.xlane.xlu1 %823 }
 0x56f   : > { %v826_v22 = vadd.f32 %v824_v21, %v810_v20 }
 0x571   : > { %828 = vst.msk [vmem:[#allocation6 + $0x8] sm:$0xff] %vm772_vm6, %v826_v22 }
 0x572 PF: > { %s2895_s11 = sld [smem:[#allocation39_spill]] }
 0x578   : > { %p1246_p1 = scmp.ne.s32.totalorder %s2895_s11, 1 }
 0x579   : > { %v861_v23 = vld [vmem:[%s2538_s1] sm:$0xff] (!%p1246_p1)  ;;  %v1247_v24 = vld [vmem:[#allocation19] ss:$0 sm:$0xff] (!%p1246_p1)  ;;  %v1998_v28 = vmov (!%p1246_p1), 0   ;;  %v878_v57 = vlaneseq (!%p1246_p1) }
 0x57a   : > { %832 = sbr.rel (%p1246_p1) target bundleno = 1562 (0x61a), region = 88  ;;  %v862_v25 = vld [vmem:[%s2538_s1 + $0x8] sm:$0xff] (!%p1246_p1)  ;;  %v870_v26 = vmul.f32 (!%p1246_p1), %v1247_v24, %v861_v23  ;;  %1521 = vset.pattern.permute.xlu1 (!%p1246_p1), %v1998_v28  ;;  %1522 = vset.pattern.permute.xlu0 (!%p1246_p1), %v1998_v28  ;;  %v855_v36 = vld [vmem:[%s2501_s8] sm:$0xff] (!%p1246_p1) }
 0x57b   : > { %v871_v27 = vmul.f32 (!%p1246_p1), %v1247_v24, %v862_v25  ;;  %v833_v29 = vld [vmem:[#allocation4] sm:$0xff] (!%p1246_p1)  ;;  %v834_v30 = vld [vmem:[#allocation4 + $0x8] sm:$0xff] (!%p1246_p1)  ;;  %v835_v34 = vld [vmem:[#allocation3] sm:$0xff] (!%p1246_p1)  ;;  %vm857_vm9 = vcmp.eq.s32.totalorder (!%p1246_p1), %v855_v36, 0  ;;  %v879_v60 = vand.u32 (!%p1246_p1), 127, %v878_v57 }
 0x57c   : > { %1523 = vlog2.f32 (!%p1246_p1), %v833_v29  ;;  %v872_v31 = vsel (!%p1246_p1), %vm675_vm5, %v870_v26, 0.0  ;;  %v851_v38 = vld [vmem:[#allocation6] sm:$0xff] (!%p1246_p1)  ;;  %v836_v39 = vld [vmem:[#allocation3 + $0x8] sm:$0xff] (!%p1246_p1)  ;;  %v852_v43 = vld [vmem:[#allocation6 + $0x8] sm:$0xff] (!%p1246_p1) }
 0x57d   : > { %873 = vadd.xlane.f32.xlu0 (!%p1246_p1), %v872_v31  ;;  %1525 = vlog2.f32 (!%p1246_p1), %v834_v30  ;;  %v875_v32 = vsel (!%p1246_p1), %vm675_vm5, %v871_v27, 0.0  ;;  %v856_v42 = vld [vmem:[%s2501_s8 + $0x8] sm:$0xff] (!%p1246_p1)  ;;  %v845_v51 = vld [vmem:[#allocation5] sm:$0xff] (!%p1246_p1)  ;;  %vm880_vm11 = vcmp.eq.s32.totalorder (!%p1246_p1), %v879_v60, 0  ;;  %vm893_vm12 = vcmp.eq.s32.totalorder (!%p1246_p1), %v879_v60, 1 }
 0x57e   : > { %1527 = vrcp.f32 (!%p1246_p1), %v834_v30  ;;  %v846_v47 = vld [vmem:[#allocation5 + $0x8] sm:$0xff] (!%p1246_p1)  ;;  %vm858_vm10 = vcmp.eq.s32.totalorder (!%p1246_p1), %v856_v42, 0  ;;  %vm906_vm13 = vcmp.eq.s32.totalorder (!%p1246_p1), %v879_v60, 2 }
 0x57f   : > { %1529 = vrcp.f32 (!%p1246_p1), %v833_v29 }
 0x581   : > { %876 = vadd.xlane.f32.xlu0 %v875_v32 }
 0x586   : > { %v1524_v33 = vpop.eup %1523 }
 0x587   : > { %v838_v35 = vmul.f32 0.6931472, %v1524_v33  ;;  %v1526_v37 = vpop.eup %1525 }
 0x588   : > { %v840_v41 = vmul.f32 0.6931472, %v1526_v37  ;;  %v1528_v44 = vpop.eup %1527 }
 0x589   : > { %v841_v40 = vadd.f32 %v838_v35, %v835_v34  ;;  %v1530_v48 = vpop.eup %1529  ;;  %v848_v52 = vmul.f32 %v1528_v44, %v846_v47 }
 0x58a   : > { %v842_v46 = vadd.f32 %v840_v41, %v836_v39  ;;  %v847_v54 = vmul.f32 %v1530_v48, %v845_v51 }
 0x58b   : > { %v853_v45 = vsub.f32 %v851_v38, %v841_v40 }
 0x58c   : > { %v854_v50 = vsub.f32 %v852_v43, %v842_v46  ;;  %v850_v55 = vsub.f32 %v842_v46, %v848_v52  ;;  %v849_v56 = vsub.f32 %v841_v40, %v847_v54 }
 0x58d   : > { %v859_v49 = vsel %vm857_vm9, 0.0, %v853_v45 }
 0x58e   : > { %883 = vperm.xlu1 %1521, %v859_v49   ;;  %v860_v53 = vsel %vm858_vm10, 0.0, %v854_v50 }
 0x592   : > { %888 = vperm.xlu1 %1521, %v860_v53  }
 0x596   : > { %901 = vperm.xlu1 %1521, %v850_v55  }
 0x597   : > { %896 = vperm.xlu0 %1522, %v849_v56  }
 0x60a   : > { %v874_v58 = vpop.xlane.xlu0 %873 }
 0x60d   : > { %v884_v59 = vpop.permute.xlu1 %883 }
 0x60e   : > { %v877_v62 = vpop.xlane.xlu0 %876  ;;  %v891_v2 = vsel %vm880_vm11, %v884_v59, 0.0 }
 0x611   : > { %v889_v61 = vpop.permute.xlu1 %888 }
 0x612   : > { %v892_v63 = vsel %vm880_vm11, %v889_v61, 0.0 }
 0x615   : > { %v902_v0 = vpop.permute.xlu1 %901 }
 0x616   : > { %v905_v1 = vsel %vm893_vm12, %v902_v0, %v892_v63  ;;  %v897_v4 = vpop.permute.xlu0 %896 }
 0x617   : > { %v908_v3 = vsel %vm906_vm13, %v877_v62, %v905_v1  ;;  %v904_v5 = vsel %vm893_vm12, %v897_v4, %v891_v2 }
 0x618   : > { %910 = vst [vmem:[%s2540_s4 + $0x8] sm:$0xff] %v908_v3  ;;  %v907_v6 = vsel %vm906_vm13, %v874_v58, %v904_v5 }
 0x619   : > { %909 = vst [vmem:[%s2540_s4] sm:$0xff] %v907_v6 }
 0x61a PF: > { %s2896_s8 = sld [smem:[#allocation40_spill]]  ;;  %s953_s19 = sshll.u32 %s2538_s1, 4  ;;  %s2606_s19 = int_to_ptr.vmem [resolvable:$true] %s953_s19 }
 0x61b   : > { %s2897_s17 = sld [smem:[#allocation61_spill]]  ;;  %s2898_s3 = sld [smem:[#allocation62_spill]] }
 0x61c   : > { %s917_s26 = scalar_lea.sflag [#allocation22], %s2489_s2  ;;  %s1745_s18 = scalar_lea.vmem %s2606_s19, 256 }
 0x61d   : > { %p1746_p2 = scmp.ne.s32.totalorder %s2606_s19, %s1745_s18  ;;  %p2899_p10 = scmp.ne.s32.totalorder %s2859_s24, 0 }
 0x61e   : > { %s1999_s1 = smov [#allocation21]  }
 0x61f   : > { %p1747_p12 = pnand %p1746_p2, %p2899_p10  ;;  %s1749_s10 = sshll.u32 %s1999_s1, 4  ;;  %s1750_s10 = int_to_ptr.vmem [resolvable:$false] %s1749_s10 }
 0x620   : > { %s1265_s0 = sshll.u32 %s2896_s8, 8  ;;  %s1751_s29 = scalar_lea.vmem %s1750_s10, 512 }
 0x621   : > { %s2604_s30 = scalar_lea.hbm %s2897_s17, %s1265_s0  ;;  %s2611_s22 = scalar_lea.hbm %s2898_s3, %s1265_s0 }
 0x622   : > { %p1748_p8 = pneg %p1747_p12  ;;  %p1752_p6 = scmp.lt.s32.totalorder %s2606_s19, %s1750_s10 }
 0x623   : > { %p1753_p9 = scmp.lt.s32.totalorder %s1751_s29, %s1745_s18 }
 0x625   : > { %p1754_p4 = por %p1753_p9, %p1752_p6 }
 0x627   : > { %p1755_p13 = pnand %p1754_p4, %p1748_p8 }
 0x629   : > { %1758 = shalt.err (!%p1755_p13)
}
 0x62a   : > { %s1759_s9 = scalar_lea.hbm %s2604_s30, 256  ;;  %s1763_s23 = scalar_lea.hbm %s2897_s17, 512 }
 0x62b   : > { %p1760_p3 = scmp.ne.s32.totalorder %s2604_s30, %s1759_s9  ;;  %p1764_p11 = scmp.lt.u32.totalorder %s2604_s30, %s2897_s17 }
 0x62c   : > { %p1765_p0 = scmp.lt.u32.totalorder %s1763_s23, %s1759_s9  ;;  %p1767_p2 = scmp.lt.u32.totalorder %s1759_s9, %s2604_s30 }
 0x62d   : > { %p1761_p7 = pnand %p1760_p3, %p2899_p10 }
 0x62e   : > { %p1766_p1 = por %p1765_p0, %p1764_p11 }
 0x62f   : > { %p1762_p5 = pneg %p1761_p7 }
 0x630   : > { %p1768_p12 = por %p1767_p2, %p1766_p1 }
 0x632   : > { %p1769_p8 = pnand %p1768_p12, %p1762_p5 }
 0x634   : > { %1772 = shalt.err (!%p1769_p8)
}
 0x635   : > { %s2000_s14 = smov 128   ;;  %s2900_s18 = sld [smem:[#allocation39_spill]] }
 0x636   : > { %s2901_s1 = sld [smem:[#allocation35_spill]]  ;;  %s2902_s10 = sld [smem:[#allocation44_spill]] }
 0x637   : > { %s2001_s29 = smov 8   ;;  %s1264_s9 = sshll.u32 %s2896_s8, 2 }
 0x638   : > { %1321 = dma.vmem_to_hbm [thread:$0]  (%p2899_p10), %s2606_s19, 256, %s2604_s30, %s917_s26, %s2000_s14, %s2000_s14, %s2001_s29  }
 0x639   : > { %s937_s0 = sshll.u32 %s519_s12, 4  ;;  %s2903_s20 = sld [smem:[#allocation60_spill]]  ;;  %s2644_s0 = int_to_ptr.vmem [resolvable:$true] %s937_s0 }
 0x63a   : > { %s969_s6 = sshll.u32 %s2540_s4, 4  ;;  %s1773_s19 = scalar_lea.vmem %s2644_s0, 128  ;;  %s2681_s6 = int_to_ptr.vmem [resolvable:$true] %s969_s6 }
 0x63b   : > { %s934_s11 = sadd.s32 %s2900_s18, %s1264_s9  ;;  %p1774_p6 = scmp.ne.s32.totalorder %s2644_s0, %s1773_s19 }
 0x63c   : > { %s1253_s23 = sshll.u32 %s934_s11, 6  ;;  %s2904_s7 = sand.u32 1, %s2901_s1  }
 0x63d   : > { %s2654_s17 = scalar_lea.sflag [#allocation11], %s2904_s7  ;;  %p2905_p9 = scmp.ne.s32.totalorder %s2902_s10, 0 }
 0x63e   : > { %s2002_s21 = smov [#allocation20]  }
 0x63f   : > { %s2649_s5 = scalar_lea.hbm %s2903_s20, %s1253_s23  ;;  %p1775_p4 = pnand %p1774_p6, %p2905_p9 }
 0x640   : > { %s1777_s12 = sshll.u32 %s2002_s21, 4  ;;  %s1778_s12 = int_to_ptr.vmem [resolvable:$false] %s1777_s12 }
 0x641   : > { %p1776_p13 = pneg %p1775_p4  ;;  %s1779_s8 = scalar_lea.vmem %s1778_s12, 256 }
 0x642   : > { %p1780_p3 = scmp.lt.s32.totalorder %s2644_s0, %s1778_s12  ;;  %p1781_p7 = scmp.lt.s32.totalorder %s1779_s8, %s1773_s19 }
 0x644   : > { %p1782_p5 = por %p1781_p7, %p1780_p3 }
 0x646   : > { %p1783_p11 = pnand %p1782_p5, %p1776_p13 }
 0x648   : > { %1786 = shalt.err (!%p1783_p11)
}
 0x649   : > { %s1787_s7 = scalar_lea.hbm %s2649_s5, 128  ;;  %s1791_s1 = scalar_lea.hbm %s2903_s20, 512 }
 0x64a   : > { %p1788_p0 = scmp.ne.s32.totalorder %s2649_s5, %s1787_s7  ;;  %p1792_p12 = scmp.lt.u32.totalorder %s2649_s5, %s2903_s20 }
 0x64b   : > { %p1793_p8 = scmp.lt.u32.totalorder %s1791_s1, %s1787_s7  ;;  %p1795_p4 = scmp.lt.u32.totalorder %s1787_s7, %s2649_s5 }
 0x64c   : > { %p1789_p1 = pnand %p1788_p0, %p2905_p9 }
 0x64d   : > { %p1794_p6 = por %p1793_p8, %p1792_p12 }
 0x64e   : > { %p1790_p2 = pneg %p1789_p1 }
 0x64f   : > { %p1796_p13 = por %p1795_p4, %p1794_p6 }
 0x651   : > { %p1797_p3 = pnand %p1796_p13, %p1790_p2 }
 0x653   : > { %1800 = shalt.err (!%p1797_p3)
}
 0x654   : > { %s2003_s23 = smov 64   ;;  %s2004_s28 = smov 4  }
 0x655   : > { %1320 = dma.vmem_to_hbm [thread:$0]  (%p2905_p9), %s2644_s0, 128, %s2649_s5, %s2654_s17, %s2003_s23, %s2000_s14, %s2004_s28  }
 0x656   : > { %s1801_s16 = scalar_lea.vmem %s2681_s6, 256  ;;  %s2005_s19 = smov [#allocation23]  }
 0x657   : > { %p1802_p7 = scmp.ne.s32.totalorder %s2681_s6, %s1801_s16  ;;  %s1805_s21 = sshll.u32 %s2005_s19, 4  ;;  %s1806_s21 = int_to_ptr.vmem [resolvable:$false] %s1805_s21 }
 0x658   : > { %s1807_s12 = scalar_lea.vmem %s1806_s21, 512  ;;  %p1808_p0 = scmp.lt.s32.totalorder %s2681_s6, %s1806_s21 }
 0x659   : > { %p1803_p5 = pnand %p1802_p7, %p2899_p10  ;;  %p1809_p1 = scmp.lt.s32.totalorder %s1807_s12, %s1801_s16 }
 0x65b   : > { %p1804_p11 = pneg %p1803_p5  ;;  %p1810_p2 = por %p1809_p1, %p1808_p0 }
 0x65d   : > { %p1811_p12 = pnand %p1810_p2, %p1804_p11 }
 0x65f   : > { %1814 = shalt.err (!%p1811_p12)
}
 0x660   : > { %s1815_s5 = scalar_lea.hbm %s2611_s22, 256  ;;  %s1819_s10 = scalar_lea.hbm %s2898_s3, 512 }
 0x661   : > { %p1816_p9 = scmp.ne.s32.totalorder %s2611_s22, %s1815_s5  ;;  %p1820_p4 = scmp.lt.u32.totalorder %s2611_s22, %s2898_s3 }
 0x662   : > { %p1821_p13 = scmp.lt.u32.totalorder %s1819_s10, %s1815_s5  ;;  %p1823_p7 = scmp.lt.u32.totalorder %s1815_s5, %s2611_s22 }
 0x663   : > { %p1817_p8 = pnand %p1816_p9, %p2899_p10 }
 0x664   : > { %p1822_p3 = por %p1821_p13, %p1820_p4 }
 0x665   : > { %p1818_p6 = pneg %p1817_p8 }
 0x666   : > { %p1824_p5 = por %p1823_p7, %p1822_p3 }
 0x668   : > { %p1825_p11 = pnand %p1824_p5, %p1818_p6 }
 0x66a   : > { %1828 = shalt.err (!%p1825_p11)
}
 0x66b   : > { %1322 = dma.vmem_to_hbm [thread:$0]  (%p2899_p10), %s2681_s6, 256, %s2611_s22, %s917_s26, %s2000_s14, %s2000_s14, %s2001_s29  }
 0x66c PF: > { %s2906_s7 = sld [smem:[#allocation34_spill]]  ;;  %s2907_s30 = sld [smem:[#allocation45_spill]] }
 0x66d   : > { %p1366_p0 = scmp.ge.s32.totalorder %s1977_s15, 2 }
 0x672   : > { %s984_s18 = sand.u32 1, %s2906_s7   ;;  %p2908_p1 = scmp.ne.s32.totalorder %s2907_s30, 0 }
 0x673   : > { %s985_s1 = scalar_lea.sflag [#allocation11], %s984_s18 }
 0x674   : > { %p1350_p2 = pnand %p1366_p0, %p2908_p1 }
 0x676   : > { %1916 = dma.done.wait (!%p1350_p2), %s985_s1, 128  }
 0x677   : > { %1918 = vsyncadd (!%p1350_p2), %s985_s1, 4294967168  ;;  %s2909_s24 = sadd.s32 4294967294, %s1977_s15   ;;  %s2910_s9 = sld [smem:[#allocation46_spill]] }
 0x678   : > { %s993_s11 = sand.u32 1, %s2909_s24  }
 0x679   : > { %s994_s2 = scalar_lea.sflag [#allocation22], %s993_s11 }
 0x67d   : > { %p2911_p12 = scmp.ne.s32.totalorder %s2910_s9, 0 }
 0x67f   : > { %p1353_p9 = pnand %p1366_p0, %p2911_p12 }
 0x681   : > { %1920 = dma.done.wait (!%p1353_p9), %s994_s2, 512  }
 0x682   : > { %1922 = vsyncadd (!%p1353_p9), %s994_s2, 4294966784  ;;  %s38_s15 = sadd.s32 1, %s1977_s15   ;;  %s2913_s23 = sld [smem:[#allocation35_spill]] }
 0x683   : > { %p2718_p10 = scmp.ge.s32.totalorder %s38_s15, 6   ;;  %s2914_s22 = sld [smem:[#allocation52_spill]] }
 0x684   : > { %s2915_s26 = sld [smem:[#allocation36_spill]]  ;;  %s2916_s14 = sld [smem:[#allocation50_spill]] }
 0x685   : > { %s2917_s28 = sld [smem:[#allocation37_spill]]  ;;  %s2918_s29 = sld [smem:[#allocation38_spill]] }
 0x686   : > { %s2919_s30 = sld [smem:[#allocation51_spill]]  ;;  %s2920_s12 = sld [smem:[#allocation41_spill]] }
 0x687   : > { %s2921_s16 = sld [smem:[#allocation48_spill]]  ;;  %s2922_s19 = sld [smem:[#allocation49_spill]] }
 0x688   : > { %s2923_s24 = smov %s1933_s25  ;;  %s2925_s0 = smov %s1945_s27 }
 0x689   : > { %s2924_s25 = smov %s2914_s22  ;;  %s2927_s11 = smov %s1969_s13 }
 0x68a   : > { %s2926_s27 = smov %s2916_s14  ;;  %37 = sbr.rel (!%p2718_p10) target bundleno = 32 (0x20), region = 184 }
 0x68d   : > { %s2928_s13 = smov %s2921_s16  ;;  %s2929_s14 = smov %s2922_s19 }
 0x691   :  { %1008 = vsyncpa [#allocation10], 1 }
 0x692   :  { %1010 = vsyncpa [#allocation10 + $0x1], 1 }
 0x693   :  { %1011 = vsyncpa [#allocation13], 1 }
 0x694   :  { %1013 = vsyncpa [#allocation13 + $0x1], 1 }
 0x695   :  { %1014 = vsyncpa [#allocation16], 1 }
 0x696   :  { %1015 = vsyncpa [#allocation11], 1 }
 0x697   :  { %1017 = vsyncpa [#allocation11 + $0x1], 1 }
 0x698   :  { %1018 = vsyncpa [#allocation22], 1 }
 0x699   :  { %1020 = vsyncpa [#allocation22 + $0x1], 1 }

</bundles_post_ra>
